<compile_context>
chip_gen: v5e
topology: v5e:2x2
jax: 0.10.0
libtpu: 0.0.40
codegen_flags: <defaults>
</compile_context>

<pallas_src>
import functools

import jax
import jax.numpy as jnp
from jax import lax
from jax.experimental import pallas as pl
from jax.experimental.pallas import tpu as pltpu

HIDDEN = 128
VOCAB = 1461  # num_embeddings (padding_idx=0)


def _round_up(x, m):
    return ((x + m - 1) // m) * m


def _vmem_capacity_bytes():
    """Per-core VMEM capacity; conservative fallback if the query fails."""
    try:
        info = pltpu.get_tpu_info()
        cap = getattr(info, "vmem_capacity_bytes", None)
        if cap:
            return int(cap)
    except Exception:
        pass
    return 64 << 20  # v7x-sized conservative default


def _chen21_kernel(gi_ref,     # (T_chunk, B_tile, 384)  gi_dtype   x@W_ih + b_ih + [b_hr|b_hz|0]
                   whh_ref,    # (128, 384)  whh_dtype   W_hh^T  (gates r|z|n)
                   bhn_ref,    # (1, 128)    f32         b_hn (cannot be folded)
                   w2_ref,     # (128, 128)  f32         fc2.weight^T
                   b2_ref,     # (1, 128)    f32
                   w1_ref,     # (128, F_pad) f32        fc1.weight^T (zero-padded)
                   b1_ref,     # (1, F_pad)  f32
                   wf_ref,     # (F_pad, C_pad) f32      fc.weight^T (zero-padded)
                   bf_ref,     # (1, C_pad)  f32
                   out_ref,    # (B_tile, C_pad) f32
                   h_ref,      # scratch (B_tile, 128) f32, persists across t-chunks
                   *, t_total, t_chunk):
    H = HIDDEN
    t_id = pl.program_id(1)
    n_t = pl.num_programs(1)
    B = h_ref.shape[0]

    # h_0 = 0 at the start of every batch tile's time sweep.
    @pl.when(t_id == 0)
    def _():
        h_ref[...] = jnp.zeros_like(h_ref)

    # Hoisted loop invariants (no CSE of broadcast_in_dim inside the loop).
    whh = whh_ref[...]                                   # (128, 384)
    mx_dtype = whh.dtype
    bhn = jnp.broadcast_to(bhn_ref[...], (B, H))         # (B, 128)

    def step(i, h):
        # h is the fori_loop carry (stays in vregs; no per-step VMEM trip).
        gi = gi_ref[i].astype(jnp.float32)               # (B, 384)
        gh = jnp.dot(h.astype(mx_dtype), whh,
                     preferred_element_type=jnp.float32)  # (B, 384)
        # sigmoid(x) == 0.5*tanh(0.5*x) + 0.5  -> one EUP op per gate.
        r = 0.5 * jnp.tanh(0.5 * (gi[:, :H] + gh[:, :H])) + 0.5
        z = 0.5 * jnp.tanh(0.5 * (gi[:, H:2 * H] + gh[:, H:2 * H])) + 0.5
        n = jnp.tanh(gi[:, 2 * H:] + r * (gh[:, 2 * H:] + bhn))
        return n + z * (h - n)                           # == (1-z)*n + z*h

    def _unroll(nsteps):
        return True if nsteps <= 32 else 8

    rem = t_total % t_chunk
    if rem == 0:
        h_ref[...] = lax.fori_loop(0, t_chunk, step, h_ref[...],
                                   unroll=_unroll(t_chunk))
    else:
        is_last = t_id == n_t - 1

        @pl.when(jnp.logical_not(is_last))
        def _():
            h_ref[...] = lax.fori_loop(0, t_chunk, step, h_ref[...],
                                       unroll=_unroll(t_chunk))

        @pl.when(is_last)
        def _():
            # Static remainder-length loop: no padded steps, no per-step mask.
            h_ref[...] = lax.fori_loop(0, rem, step, h_ref[...],
                                       unroll=_unroll(rem))

    # Epilogue only on the last time chunk:
    # relu(h_T) -> (dropout == identity) -> fc2 -> relu -> fc1 -> relu -> fc
    @pl.when(t_id == n_t - 1)
    def _():
        feat = jnp.maximum(h_ref[...], 0.0)
        # TODO(synk): dropout(p=0.3, training=True) omitted (identity / eval).
        feat = jnp.maximum(
            jnp.dot(feat, w2_ref[...], preferred_element_type=jnp.float32)
            + b2_ref[...], 0.0)
        feat = jnp.maximum(
            jnp.dot(feat, w1_ref[...], preferred_element_type=jnp.float32)
            + b1_ref[...], 0.0)
        out_ref[...] = (jnp.dot(feat, wf_ref[...],
                                preferred_element_type=jnp.float32)
                        + bf_ref[...]).astype(out_ref.dtype)


def init_params(key, out_features_size=32, num_classes=10):
    """Deterministic synthetic parameters matching PyTorch module shapes."""
    ks = jax.random.split(key, 12)

    def unif(k, shape, fan_in):
        bound = 1.0 / jnp.sqrt(jnp.float32(fan_in))
        return jax.random.uniform(k, shape, jnp.float32, -bound, bound)

    emb_table = jax.random.normal(ks[0], (VOCAB, HIDDEN), jnp.float32)
    emb_table = emb_table.at[0].set(0.0)  # padding_idx=0

    return dict(
        embedding=emb_table,
        # GRU (gate order r, z, n), stored already transposed.
        w_ih_t=unif(ks[1], (HIDDEN, 3 * HIDDEN), HIDDEN),
        w_hh_t=unif(ks[2], (HIDDEN, 3 * HIDDEN), HIDDEN),
        b_ih=unif(ks[3], (1, 3 * HIDDEN), HIDDEN),
        b_hh=unif(ks[4], (1, 3 * HIDDEN), HIDDEN),
        # fc2: 128 -> 128
        w2_t=unif(ks[5], (HIDDEN, HIDDEN), HIDDEN),
        b2=unif(ks[6], (1, HIDDEN), HIDDEN),
        # fc1: 128 -> out_features_size
        w1_t=unif(ks[7], (HIDDEN, out_features_size), HIDDEN),
        b1=unif(ks[8], (1, out_features_size), HIDDEN),
        # fc: out_features_size -> num_classes
        wf_t=unif(ks[9], (out_features_size, num_classes), out_features_size),
        bf=unif(ks[10], (1, num_classes), out_features_size),
    )


@functools.partial(jax.jit, static_argnames=(
    "num_classes", "gi_dtype", "whh_dtype", "t_chunk_cap"))
def chen21rnn_forward(x, params, num_classes=10, gi_dtype=jnp.bfloat16,
                      whh_dtype=jnp.bfloat16, t_chunk_cap=None):
    """x: (B, 1, num_pkts) float32 in [0, 1]. Returns (B, num_classes) f32."""
    B, _, T = x.shape
    F = params["w1_t"].shape[1]
    H = HIDDEN

    # --- batch / class / feature padding -----------------------------------
    B_pad = _round_up(max(B, 8), 8)
    if B_pad < 16:
        B_tile = B_pad                        # too small to split
    elif B_pad <= 256:
        B_pad = _round_up(B_pad, 16)
        B_tile = B_pad // 2                   # >= 2 "parallel" tiles (v7x megacore)
    else:
        B_tile = 128
        B_pad = _round_up(B_pad, 128)

    C_pad = _round_up(num_classes, 128)       # lane-dense output stores
    F_pad = _round_up(F, 128)                 # lane-dense epilogue intermediates

    # --- generation-aware time chunking (fit double-buffered gi in VMEM) ---
    gi_isz = jnp.dtype(gi_dtype).itemsize
    vmem_cap = _vmem_capacity_bytes()
    gi_budget = int(0.35 * vmem_cap)          # for BOTH gi pipeline buffers
    bytes_per_step = B_tile * 3 * H * gi_isz
    T_chunk = int(min(T, max(8, gi_budget // (2 * bytes_per_step)), 512))
    if t_chunk_cap is not None:
        T_chunk = min(T_chunk, int(t_chunk_cap))
    T_chunk = max(min(T_chunk, T), 1)
    T_pad = _round_up(T, T_chunk)

    # --- glue: fold embedding + input-linear (+ r/z recurrent bias) --------
    # gather(emb, idx) @ W_ih + b  ==  gather(emb @ W_ih + b, idx)
    idx = (x * 1460.0).astype(jnp.int32).reshape(B, T).T            # (T, B) time-major
    bhh_rz = jnp.concatenate(
        [params["b_hh"][:, :2 * H], jnp.zeros((1, H), jnp.float32)], axis=1)
    gi_table = (params["embedding"] @ params["w_ih_t"]
                + params["b_ih"] + bhh_rz).astype(gi_dtype)          # (1461, 384)
    gi_seq = jnp.take(gi_table, idx, axis=0)                         # (T, B, 384)
    gi_seq = jnp.pad(gi_seq, ((0, T_pad - T), (0, B_pad - B), (0, 0)))

    whh = params["w_hh_t"].astype(whh_dtype)
    bhn = params["b_hh"][:, 2 * H:]                                  # (1, 128) f32
    w1_pad = jnp.pad(params["w1_t"], ((0, 0), (0, F_pad - F)))
    b1_pad = jnp.pad(params["b1"], ((0, 0), (0, F_pad - F)))
    wf_pad = jnp.pad(params["wf_t"], ((0, F_pad - F), (0, C_pad - num_classes)))
    bf_pad = jnp.pad(params["bf"], ((0, 0), (0, C_pad - num_classes)))

    grid = (B_pad // B_tile, T_pad // T_chunk)

    # --- VMEM accounting: request what we actually need --------------------
    gi_block = T_chunk * B_tile * 3 * H * gi_isz
    whh_isz = jnp.dtype(whh_dtype).itemsize
    weights = (H * 3 * H * whh_isz + H * 4
               + (H * H + H) * 4
               + (H * F_pad + F_pad) * 4
               + (F_pad * C_pad + C_pad) * 4)
    out_block = B_tile * C_pad * 4
    scratch = B_tile * H * 4
    needed = 2 * gi_block + 2 * weights + 2 * out_block + scratch
    vmem_limit = int(min(vmem_cap, max(needed + (4 << 20), 16 << 20)))

    const_map = lambda b, t: (0, 0)
    kernel = functools.partial(_chen21_kernel, t_total=T, t_chunk=T_chunk)

    out = pl.pallas_call(
        kernel,
        out_shape=jax.ShapeDtypeStruct((B_pad, C_pad), jnp.float32),
        grid=grid,
        in_specs=[
            pl.BlockSpec((T_chunk, B_tile, 3 * H), lambda b, t: (t, b, 0)),
            pl.BlockSpec((H, 3 * H), const_map),      # W_hh^T
            pl.BlockSpec((1, H), const_map),          # b_hn
            pl.BlockSpec((H, H), const_map),          # fc2 W^T
            pl.BlockSpec((1, H), const_map),          # fc2 b
            pl.BlockSpec((H, F_pad), const_map),      # fc1 W^T (padded)
            pl.BlockSpec((1, F_pad), const_map),      # fc1 b   (padded)
            pl.BlockSpec((F_pad, C_pad), const_map),  # fc  W^T (padded)
            pl.BlockSpec((1, C_pad), const_map),      # fc  b   (padded)
        ],
        out_specs=pl.BlockSpec((B_tile, C_pad), lambda b, t: (b, 0)),
        scratch_shapes=[pltpu.VMEM((B_tile, H), jnp.float32)],
        compiler_params=pltpu.CompilerParams(
            dimension_semantics=("parallel", "arbitrary"),
            vmem_limit_bytes=vmem_limit),
    )(gi_seq, whh, bhn,
      params["w2_t"], params["b2"],
      w1_pad, b1_pad, wf_pad, bf_pad)
    return out[:B, :num_classes]


def _reference_forward(x, params):
    """Pure-JAX reference with PyTorch GRU semantics (correctness check)."""
    B, _, T = x.shape
    idx = (x * 1460.0).astype(jnp.int32).reshape(B, T)
    emb = jnp.take(params["embedding"], idx, axis=0)
    H = HIDDEN

    def step(h, x_t):
        gi = x_t @ params["w_ih_t"] + params["b_ih"]
        gh = h @ params["w_hh_t"] + params["b_hh"]
        r = jax.nn.sigmoid(gi[:, :H] + gh[:, :H])
        z = jax.nn.sigmoid(gi[:, H:2 * H] + gh[:, H:2 * H])
        n = jnp.tanh(gi[:, 2 * H:] + r * gh[:, 2 * H:])
        h = (1.0 - z) * n + z * h
        return h, None

    h0 = jnp.zeros((B, H), jnp.float32)
    h_last, _ = lax.scan(step, h0, jnp.transpose(emb, (1, 0, 2)))
    feat = jnp.maximum(h_last, 0.0)
    feat = jnp.maximum(feat @ params["w2_t"] + params["b2"], 0.0)
    feat = jnp.maximum(feat @ params["w1_t"] + params["b1"], 0.0)
    return feat @ params["wf_t"] + params["bf"]


if __name__ == "__main__":
    key = jax.random.PRNGKey(0)
    k_param, k_x = jax.random.split(key)

    B, num_pkts = 2, 8
    out_features_size, num_classes = 32, 10

    params = init_params(k_param, out_features_size, num_classes)
    # PLs input: (B, 1, num_pkts), values in [0, 1]
    x = jax.random.uniform(k_x, (B, 1, num_pkts), jnp.float32)

    ref = jax.block_until_ready(_reference_forward(x, params))

    # 1) Exactness: f32 everywhere, tiny T_chunk so the multi-chunk h carry
    #    and the remainder (T % T_chunk != 0) path are both exercised.
    out_f32 = chen21rnn_forward(x, params, num_classes=num_classes,
                                gi_dtype=jnp.float32, whh_dtype=jnp.float32,
                                t_chunk_cap=3)
    out_f32 = jax.block_until_ready(out_f32)
    assert out_f32.shape == (B, num_classes)
    assert jnp.allclose(out_f32, ref, atol=1e-3, rtol=1e-3), "f32 kernel mismatch"

    # 2) Default (performance) config: bf16 gi stream + bf16 recurrent matmul.
    out_bf16 = jax.block_until_ready(
        chen21rnn_forward(x, params, num_classes=num_classes))
    assert out_bf16.shape == (B, num_classes)
    assert jnp.allclose(out_bf16, ref, atol=5e-2, rtol=5e-2), \
        "bf16 kernel drift too large"

    print("KERNEL_OK")
</pallas_src>

<mosaic_0001>
module attributes {stable_mosaic.version = 11 : i64} {
  func.func @_chen21_kernel(%arg0: i32, %arg1: i32, %arg2: memref<3x8x384xf32, #tpu.memory_space<vmem>>, %arg3: memref<128x384xf32, #tpu.memory_space<vmem>>, %arg4: memref<1x128xf32, #tpu.memory_space<vmem>>, %arg5: memref<128x128xf32, #tpu.memory_space<vmem>>, %arg6: memref<1x128xf32, #tpu.memory_space<vmem>>, %arg7: memref<128x128xf32, #tpu.memory_space<vmem>>, %arg8: memref<1x128xf32, #tpu.memory_space<vmem>>, %arg9: memref<128x128xf32, #tpu.memory_space<vmem>>, %arg10: memref<1x128xf32, #tpu.memory_space<vmem>>, %arg11: memref<8x128xf32, #tpu.memory_space<vmem>>, %arg12: memref<8x128xf32, #tpu.memory_space<vmem>>) attributes {dimension_semantics = [#tpu.dimension_semantics<parallel>, #tpu.dimension_semantics<arbitrary>], iteration_bounds = array<i64: 1, 3>, scalar_prefetch = 0 : i64, scratch_operands = 1 : i64, tpu.core_type = #tpu.core_type<tc>, window_params = [{transform_indices = @transform_0, window_bounds = array<i64: 3, 8, 384>}, {pipeline_mode = #tpu.pipeline_mode<synchronous>, transform_indices = @transform_1, window_bounds = array<i64: 128, 384>}, {pipeline_mode = #tpu.pipeline_mode<synchronous>, transform_indices = @transform_2, window_bounds = array<i64: 1, 128>}, {pipeline_mode = #tpu.pipeline_mode<synchronous>, transform_indices = @transform_3, window_bounds = array<i64: 128, 128>}, {pipeline_mode = #tpu.pipeline_mode<synchronous>, transform_indices = @transform_4, window_bounds = array<i64: 1, 128>}, {pipeline_mode = #tpu.pipeline_mode<synchronous>, transform_indices = @transform_5, window_bounds = array<i64: 128, 128>}, {pipeline_mode = #tpu.pipeline_mode<synchronous>, transform_indices = @transform_6, window_bounds = array<i64: 1, 128>}, {pipeline_mode = #tpu.pipeline_mode<synchronous>, transform_indices = @transform_7, window_bounds = array<i64: 128, 128>}, {pipeline_mode = #tpu.pipeline_mode<synchronous>, transform_indices = @transform_8, window_bounds = array<i64: 1, 128>}, {transform_indices = @transform_9, window_bounds = array<i64: 8, 128>}]} {
    %c0_i32 = arith.constant 0 : i32
    %0 = arith.cmpi eq, %arg1, %c0_i32 : i32
    %1 = arith.extui %0 : i1 to i32
    %c0_i32_0 = arith.constant 0 : i32
    %2 = arith.cmpi ne, %1, %c0_i32_0 : i32
    scf.if %2 {
      %cst = arith.constant 0.000000e+00 : f32
      %16 = vector.broadcast %cst : f32 to vector<8x128xf32>
      %c0_8 = arith.constant 0 : index
      %c0_9 = arith.constant 0 : index
      %17 = vector.load %arg12[%c0_8, %c0_9] : memref<8x128xf32, #tpu.memory_space<vmem>>, vector<8x128xf32>
      tpu.vector_store %arg12[%c0_8, %c0_9], %16 {strides = array<i32>} : memref<8x128xf32, #tpu.memory_space<vmem>>, vector<8x128xf32>,
    } else {
    }
    %c0 = arith.constant 0 : index
    %c0_1 = arith.constant 0 : index
    %3 = vector.load %arg3[%c0, %c0_1] : memref<128x384xf32, #tpu.memory_space<vmem>>, vector<128x384xf32>
    %c0_2 = arith.constant 0 : index
    %c0_3 = arith.constant 0 : index
    %4 = vector.load %arg4[%c0_2, %c0_3] : memref<1x128xf32, #tpu.memory_space<vmem>>, vector<1x128xf32>
    %5 = vector.shape_cast %4 : vector<1x128xf32> to vector<1x128xf32>
    %6 = vector.broadcast %5 : vector<1x128xf32> to vector<8x128xf32>
    %c2_i32 = arith.constant 2 : i32
    %7 = arith.cmpi eq, %arg1, %c2_i32 : i32
    %true = arith.constant true
    %8 = arith.xori %7, %true : i1
    %9 = arith.extui %8 : i1 to i32
    %c0_i32_4 = arith.constant 0 : i32
    %10 = arith.cmpi ne, %9, %c0_i32_4 : i32
    scf.if %10 {
      %c0_8 = arith.constant 0 : index
      %c0_9 = arith.constant 0 : index
      %16 = vector.load %arg12[%c0_8, %c0_9] : memref<8x128xf32, #tpu.memory_space<vmem>>, vector<8x128xf32>
      %c0_i32_10 = arith.constant 0 : i32
      %17 = arith.index_cast %c0_i32_10 : i32 to index
      %c0_11 = arith.constant 0 : index
      %c0_12 = arith.constant 0 : index
      %18 = vector.load %arg2[%17, %c0_11, %c0_12] : memref<3x8x384xf32, #tpu.memory_space<vmem>>, vector<1x8x384xf32>
      %19 = vector.shape_cast %18 : vector<1x8x384xf32> to vector<8x384xf32>
      %cst = arith.constant dense<0.000000e+00> : vector<8x384xf32>
      %20 = tpu.matmul %16, %3, %cst {dimension_numbers = #tpu.dot_dimension_numbers<[1], [0], [0], [1], [0, 0, 1, 1], [], []>} : vector<8x128xf32>, vector<128x384xf32>, vector<8x384xf32> -> vector<8x384xf32>
      %21 = vector.extract_strided_slice %19 {offsets = [0, 0], sizes = [8, 128], strides = [1, 1]} : vector<8x384xf32> to vector<8x128xf32>
      %22 = vector.extract_strided_slice %20 {offsets = [0, 0], sizes = [8, 128], strides = [1, 1]} : vector<8x384xf32> to vector<8x128xf32>
      %23 = arith.addf %21, %22 : vector<8x128xf32>
      %cst_13 = arith.constant 5.000000e-01 : f32
      %24 = vector.broadcast %cst_13 : f32 to vector<8x128xf32>
      %25 = arith.mulf %24, %23 : vector<8x128xf32>
      %26 = math.tanh %25 : vector<8x128xf32>
      %cst_14 = arith.constant 5.000000e-01 : f32
      %27 = vector.broadcast %cst_14 : f32 to vector<8x128xf32>
      %28 = arith.mulf %27, %26 : vector<8x128xf32>
      %cst_15 = arith.constant 5.000000e-01 : f32
      %29 = vector.broadcast %cst_15 : f32 to vector<8x128xf32>
      %30 = arith.addf %28, %29 : vector<8x128xf32>
      %31 = vector.extract_strided_slice %19 {offsets = [0, 128], sizes = [8, 128], strides = [1, 1]} : vector<8x384xf32> to vector<8x128xf32>
      %32 = vector.extract_strided_slice %20 {offsets = [0, 128], sizes = [8, 128], strides = [1, 1]} : vector<8x384xf32> to vector<8x128xf32>
      %33 = arith.addf %31, %32 : vector<8x128xf32>
      %cst_16 = arith.constant 5.000000e-01 : f32
      %34 = vector.broadcast %cst_16 : f32 to vector<8x128xf32>
      %35 = arith.mulf %34, %33 : vector<8x128xf32>
      %36 = math.tanh %35 : vector<8x128xf32>
      %cst_17 = arith.constant 5.000000e-01 : f32
      %37 = vector.broadcast %cst_17 : f32 to vector<8x128xf32>
      %38 = arith.mulf %37, %36 : vector<8x128xf32>
      %cst_18 = arith.constant 5.000000e-01 : f32
      %39 = vector.broadcast %cst_18 : f32 to vector<8x128xf32>
      %40 = arith.addf %38, %39 : vector<8x128xf32>
      %41 = vector.extract_strided_slice %19 {offsets = [0, 256], sizes = [8, 128], strides = [1, 1]} : vector<8x384xf32> to vector<8x128xf32>
      %42 = vector.extract_strided_slice %20 {offsets = [0, 256], sizes = [8, 128], strides = [1, 1]} : vector<8x384xf32> to vector<8x128xf32>
      %43 = arith.addf %42, %6 : vector<8x128xf32>
      %44 = arith.mulf %30, %43 : vector<8x128xf32>
      %45 = arith.addf %41, %44 : vector<8x128xf32>
      %46 = math.tanh %45 : vector<8x128xf32>
      %47 = arith.subf %16, %46 : vector<8x128xf32>
      %48 = arith.mulf %40, %47 : vector<8x128xf32>
      %49 = arith.addf %46, %48 : vector<8x128xf32>
      %c1_i32 = arith.constant 1 : i32
      %50 = arith.index_cast %c1_i32 : i32 to index
      %c0_19 = arith.constant 0 : index
      %c0_20 = arith.constant 0 : index
      %51 = vector.load %arg2[%50, %c0_19, %c0_20] : memref<3x8x384xf32, #tpu.memory_space<vmem>>, vector<1x8x384xf32>
      %52 = vector.shape_cast %51 : vector<1x8x384xf32> to vector<8x384xf32>
      %cst_21 = arith.constant dense<0.000000e+00> : vector<8x384xf32>
      %53 = tpu.matmul %49, %3, %cst_21 {dimension_numbers = #tpu.dot_dimension_numbers<[1], [0], [0], [1], [0, 0, 1, 1], [], []>} : vector<8x128xf32>, vector<128x384xf32>, vector<8x384xf32> -> vector<8x384xf32>
      %54 = vector.extract_strided_slice %52 {offsets = [0, 0], sizes = [8, 128], strides = [1, 1]} : vector<8x384xf32> to vector<8x128xf32>
      %55 = vector.extract_strided_slice %53 {offsets = [0, 0], sizes = [8, 128], strides = [1, 1]} : vector<8x384xf32> to vector<8x128xf32>
      %56 = arith.addf %54, %55 : vector<8x128xf32>
      %cst_22 = arith.constant 5.000000e-01 : f32
      %57 = vector.broadcast %cst_22 : f32 to vector<8x128xf32>
      %58 = arith.mulf %57, %56 : vector<8x128xf32>
      %59 = math.tanh %58 : vector<8x128xf32>
      %cst_23 = arith.constant 5.000000e-01 : f32
      %60 = vector.broadcast %cst_23 : f32 to vector<8x128xf32>
      %61 = arith.mulf %60, %59 : vector<8x128xf32>
      %cst_24 = arith.constant 5.000000e-01 : f32
      %62 = vector.broadcast %cst_24 : f32 to vector<8x128xf32>
      %63 = arith.addf %61, %62 : vector<8x128xf32>
      %64 = vector.extract_strided_slice %52 {offsets = [0, 128], sizes = [8, 128], strides = [1, 1]} : vector<8x384xf32> to vector<8x128xf32>
      %65 = vector.extract_strided_slice %53 {offsets = [0, 128], sizes = [8, 128], strides = [1, 1]} : vector<8x384xf32> to vector<8x128xf32>
      %66 = arith.addf %64, %65 : vector<8x128xf32>
      %cst_25 = arith.constant 5.000000e-01 : f32
      %67 = vector.broadcast %cst_25 : f32 to vector<8x128xf32>
      %68 = arith.mulf %67, %66 : vector<8x128xf32>
      %69 = math.tanh %68 : vector<8x128xf32>
      %cst_26 = arith.constant 5.000000e-01 : f32
      %70 = vector.broadcast %cst_26 : f32 to vector<8x128xf32>
      %71 = arith.mulf %70, %69 : vector<8x128xf32>
      %cst_27 = arith.constant 5.000000e-01 : f32
      %72 = vector.broadcast %cst_27 : f32 to vector<8x128xf32>
      %73 = arith.addf %71, %72 : vector<8x128xf32>
      %74 = vector.extract_strided_slice %52 {offsets = [0, 256], sizes = [8, 128], strides = [1, 1]} : vector<8x384xf32> to vector<8x128xf32>
      %75 = vector.extract_strided_slice %53 {offsets = [0, 256], sizes = [8, 128], strides = [1, 1]} : vector<8x384xf32> to vector<8x128xf32>
      %76 = arith.addf %75, %6 : vector<8x128xf32>
      %77 = arith.mulf %63, %76 : vector<8x128xf32>
      %78 = arith.addf %74, %77 : vector<8x128xf32>
      %79 = math.tanh %78 : vector<8x128xf32>
      %80 = arith.subf %49, %79 : vector<8x128xf32>
      %81 = arith.mulf %73, %80 : vector<8x128xf32>
      %82 = arith.addf %79, %81 : vector<8x128xf32>
      %c2_i32_28 = arith.constant 2 : i32
      %83 = arith.index_cast %c2_i32_28 : i32 to index
      %c0_29 = arith.constant 0 : index
      %c0_30 = arith.constant 0 : index
      %84 = vector.load %arg2[%83, %c0_29, %c0_30] : memref<3x8x384xf32, #tpu.memory_space<vmem>>, vector<1x8x384xf32>
      %85 = vector.shape_cast %84 : vector<1x8x384xf32> to vector<8x384xf32>
      %cst_31 = arith.constant dense<0.000000e+00> : vector<8x384xf32>
      %86 = tpu.matmul %82, %3, %cst_31 {dimension_numbers = #tpu.dot_dimension_numbers<[1], [0], [0], [1], [0, 0, 1, 1], [], []>} : vector<8x128xf32>, vector<128x384xf32>, vector<8x384xf32> -> vector<8x384xf32>
      %87 = vector.extract_strided_slice %85 {offsets = [0, 0], sizes = [8, 128], strides = [1, 1]} : vector<8x384xf32> to vector<8x128xf32>
      %88 = vector.extract_strided_slice %86 {offsets = [0, 0], sizes = [8, 128], strides = [1, 1]} : vector<8x384xf32> to vector<8x128xf32>
      %89 = arith.addf %87, %88 : vector<8x128xf32>
      %cst_32 = arith.constant 5.000000e-01 : f32
      %90 = vector.broadcast %cst_32 : f32 to vector<8x128xf32>
      %91 = arith.mulf %90, %89 : vector<8x128xf32>
      %92 = math.tanh %91 : vector<8x128xf32>
      %cst_33 = arith.constant 5.000000e-01 : f32
      %93 = vector.broadcast %cst_33 : f32 to vector<8x128xf32>
      %94 = arith.mulf %93, %92 : vector<8x128xf32>
      %cst_34 = arith.constant 5.000000e-01 : f32
      %95 = vector.broadcast %cst_34 : f32 to vector<8x128xf32>
      %96 = arith.addf %94, %95 : vector<8x128xf32>
      %97 = vector.extract_strided_slice %85 {offsets = [0, 128], sizes = [8, 128], strides = [1, 1]} : vector<8x384xf32> to vector<8x128xf32>
      %98 = vector.extract_strided_slice %86 {offsets = [0, 128], sizes = [8, 128], strides = [1, 1]} : vector<8x384xf32> to vector<8x128xf32>
      %99 = arith.addf %97, %98 : vector<8x128xf32>
      %cst_35 = arith.constant 5.000000e-01 : f32
      %100 = vector.broadcast %cst_35 : f32 to vector<8x128xf32>
      %101 = arith.mulf %100, %99 : vector<8x128xf32>
      %102 = math.tanh %101 : vector<8x128xf32>
      %cst_36 = arith.constant 5.000000e-01 : f32
      %103 = vector.broadcast %cst_36 : f32 to vector<8x128xf32>
      %104 = arith.mulf %103, %102 : vector<8x128xf32>
      %cst_37 = arith.constant 5.000000e-01 : f32
      %105 = vector.broadcast %cst_37 : f32 to vector<8x128xf32>
      %106 = arith.addf %104, %105 : vector<8x128xf32>
      %107 = vector.extract_strided_slice %85 {offsets = [0, 256], sizes = [8, 128], strides = [1, 1]} : vector<8x384xf32> to vector<8x128xf32>
      %108 = vector.extract_strided_slice %86 {offsets = [0, 256], sizes = [8, 128], strides = [1, 1]} : vector<8x384xf32> to vector<8x128xf32>
      %109 = arith.addf %108, %6 : vector<8x128xf32>
      %110 = arith.mulf %96, %109 : vector<8x128xf32>
      %111 = arith.addf %107, %110 : vector<8x128xf32>
      %112 = math.tanh %111 : vector<8x128xf32>
      %113 = arith.subf %82, %112 : vector<8x128xf32>
      %114 = arith.mulf %106, %113 : vector<8x128xf32>
      %115 = arith.addf %112, %114 : vector<8x128xf32>
      %c3_i32 = arith.constant 3 : i32
      %c0_38 = arith.constant 0 : index
      %c0_39 = arith.constant 0 : index
      %116 = vector.load %arg12[%c0_38, %c0_39] : memref<8x128xf32, #tpu.memory_space<vmem>>, vector<8x128xf32>
      tpu.vector_store %arg12[%c0_38, %c0_39], %115 {strides = array<i32>} : memref<8x128xf32, #tpu.memory_space<vmem>>, vector<8x128xf32>,
    } else {
    }
    %11 = arith.extui %7 : i1 to i32
    %c0_i32_5 = arith.constant 0 : i32
    %12 = arith.cmpi ne, %11, %c0_i32_5 : i32
    scf.if %12 {
      %c0_8 = arith.constant 0 : index
      %c0_9 = arith.constant 0 : index
      %16 = vector.load %arg12[%c0_8, %c0_9] : memref<8x128xf32, #tpu.memory_space<vmem>>, vector<8x128xf32>
      %c0_i32_10 = arith.constant 0 : i32
      %17 = arith.index_cast %c0_i32_10 : i32 to index
      %c0_11 = arith.constant 0 : index
      %c0_12 = arith.constant 0 : index
      %18 = vector.load %arg2[%17, %c0_11, %c0_12] : memref<3x8x384xf32, #tpu.memory_space<vmem>>, vector<1x8x384xf32>
      %19 = vector.shape_cast %18 : vector<1x8x384xf32> to vector<8x384xf32>
      %cst = arith.constant dense<0.000000e+00> : vector<8x384xf32>
      %20 = tpu.matmul %16, %3, %cst {dimension_numbers = #tpu.dot_dimension_numbers<[1], [0], [0], [1], [0, 0, 1, 1], [], []>} : vector<8x128xf32>, vector<128x384xf32>, vector<8x384xf32> -> vector<8x384xf32>
      %21 = vector.extract_strided_slice %19 {offsets = [0, 0], sizes = [8, 128], strides = [1, 1]} : vector<8x384xf32> to vector<8x128xf32>
      %22 = vector.extract_strided_slice %20 {offsets = [0, 0], sizes = [8, 128], strides = [1, 1]} : vector<8x384xf32> to vector<8x128xf32>
      %23 = arith.addf %21, %22 : vector<8x128xf32>
      %cst_13 = arith.constant 5.000000e-01 : f32
      %24 = vector.broadcast %cst_13 : f32 to vector<8x128xf32>
      %25 = arith.mulf %24, %23 : vector<8x128xf32>
      %26 = math.tanh %25 : vector<8x128xf32>
      %cst_14 = arith.constant 5.000000e-01 : f32
      %27 = vector.broadcast %cst_14 : f32 to vector<8x128xf32>
      %28 = arith.mulf %27, %26 : vector<8x128xf32>
      %cst_15 = arith.constant 5.000000e-01 : f32
      %29 = vector.broadcast %cst_15 : f32 to vector<8x128xf32>
      %30 = arith.addf %28, %29 : vector<8x128xf32>
      %31 = vector.extract_strided_slice %19 {offsets = [0, 128], sizes = [8, 128], strides = [1, 1]} : vector<8x384xf32> to vector<8x128xf32>
      %32 = vector.extract_strided_slice %20 {offsets = [0, 128], sizes = [8, 128], strides = [1, 1]} : vector<8x384xf32> to vector<8x128xf32>
      %33 = arith.addf %31, %32 : vector<8x128xf32>
      %cst_16 = arith.constant 5.000000e-01 : f32
      %34 = vector.broadcast %cst_16 : f32 to vector<8x128xf32>
      %35 = arith.mulf %34, %33 : vector<8x128xf32>
      %36 = math.tanh %35 : vector<8x128xf32>
      %cst_17 = arith.constant 5.000000e-01 : f32
      %37 = vector.broadcast %cst_17 : f32 to vector<8x128xf32>
      %38 = arith.mulf %37, %36 : vector<8x128xf32>
      %cst_18 = arith.constant 5.000000e-01 : f32
      %39 = vector.broadcast %cst_18 : f32 to vector<8x128xf32>
      %40 = arith.addf %38, %39 : vector<8x128xf32>
      %41 = vector.extract_strided_slice %19 {offsets = [0, 256], sizes = [8, 128], strides = [1, 1]} : vector<8x384xf32> to vector<8x128xf32>
      %42 = vector.extract_strided_slice %20 {offsets = [0, 256], sizes = [8, 128], strides = [1, 1]} : vector<8x384xf32> to vector<8x128xf32>
      %43 = arith.addf %42, %6 : vector<8x128xf32>
      %44 = arith.mulf %30, %43 : vector<8x128xf32>
      %45 = arith.addf %41, %44 : vector<8x128xf32>
      %46 = math.tanh %45 : vector<8x128xf32>
      %47 = arith.subf %16, %46 : vector<8x128xf32>
      %48 = arith.mulf %40, %47 : vector<8x128xf32>
      %49 = arith.addf %46, %48 : vector<8x128xf32>
      %c1_i32 = arith.constant 1 : i32
      %50 = arith.index_cast %c1_i32 : i32 to index
      %c0_19 = arith.constant 0 : index
      %c0_20 = arith.constant 0 : index
      %51 = vector.load %arg2[%50, %c0_19, %c0_20] : memref<3x8x384xf32, #tpu.memory_space<vmem>>, vector<1x8x384xf32>
      %52 = vector.shape_cast %51 : vector<1x8x384xf32> to vector<8x384xf32>
      %cst_21 = arith.constant dense<0.000000e+00> : vector<8x384xf32>
      %53 = tpu.matmul %49, %3, %cst_21 {dimension_numbers = #tpu.dot_dimension_numbers<[1], [0], [0], [1], [0, 0, 1, 1], [], []>} : vector<8x128xf32>, vector<128x384xf32>, vector<8x384xf32> -> vector<8x384xf32>
      %54 = vector.extract_strided_slice %52 {offsets = [0, 0], sizes = [8, 128], strides = [1, 1]} : vector<8x384xf32> to vector<8x128xf32>
      %55 = vector.extract_strided_slice %53 {offsets = [0, 0], sizes = [8, 128], strides = [1, 1]} : vector<8x384xf32> to vector<8x128xf32>
      %56 = arith.addf %54, %55 : vector<8x128xf32>
      %cst_22 = arith.constant 5.000000e-01 : f32
      %57 = vector.broadcast %cst_22 : f32 to vector<8x128xf32>
      %58 = arith.mulf %57, %56 : vector<8x128xf32>
      %59 = math.tanh %58 : vector<8x128xf32>
      %cst_23 = arith.constant 5.000000e-01 : f32
      %60 = vector.broadcast %cst_23 : f32 to vector<8x128xf32>
      %61 = arith.mulf %60, %59 : vector<8x128xf32>
      %cst_24 = arith.constant 5.000000e-01 : f32
      %62 = vector.broadcast %cst_24 : f32 to vector<8x128xf32>
      %63 = arith.addf %61, %62 : vector<8x128xf32>
      %64 = vector.extract_strided_slice %52 {offsets = [0, 128], sizes = [8, 128], strides = [1, 1]} : vector<8x384xf32> to vector<8x128xf32>
      %65 = vector.extract_strided_slice %53 {offsets = [0, 128], sizes = [8, 128], strides = [1, 1]} : vector<8x384xf32> to vector<8x128xf32>
      %66 = arith.addf %64, %65 : vector<8x128xf32>
      %cst_25 = arith.constant 5.000000e-01 : f32
      %67 = vector.broadcast %cst_25 : f32 to vector<8x128xf32>
      %68 = arith.mulf %67, %66 : vector<8x128xf32>
      %69 = math.tanh %68 : vector<8x128xf32>
      %cst_26 = arith.constant 5.000000e-01 : f32
      %70 = vector.broadcast %cst_26 : f32 to vector<8x128xf32>
      %71 = arith.mulf %70, %69 : vector<8x128xf32>
      %cst_27 = arith.constant 5.000000e-01 : f32
      %72 = vector.broadcast %cst_27 : f32 to vector<8x128xf32>
      %73 = arith.addf %71, %72 : vector<8x128xf32>
      %74 = vector.extract_strided_slice %52 {offsets = [0, 256], sizes = [8, 128], strides = [1, 1]} : vector<8x384xf32> to vector<8x128xf32>
      %75 = vector.extract_strided_slice %53 {offsets = [0, 256], sizes = [8, 128], strides = [1, 1]} : vector<8x384xf32> to vector<8x128xf32>
      %76 = arith.addf %75, %6 : vector<8x128xf32>
      %77 = arith.mulf %63, %76 : vector<8x128xf32>
      %78 = arith.addf %74, %77 : vector<8x128xf32>
      %79 = math.tanh %78 : vector<8x128xf32>
      %80 = arith.subf %49, %79 : vector<8x128xf32>
      %81 = arith.mulf %73, %80 : vector<8x128xf32>
      %82 = arith.addf %79, %81 : vector<8x128xf32>
      %c2_i32_28 = arith.constant 2 : i32
      %c0_29 = arith.constant 0 : index
      %c0_30 = arith.constant 0 : index
      %83 = vector.load %arg12[%c0_29, %c0_30] : memref<8x128xf32, #tpu.memory_space<vmem>>, vector<8x128xf32>
      tpu.vector_store %arg12[%c0_29, %c0_30], %82 {strides = array<i32>} : memref<8x128xf32, #tpu.memory_space<vmem>>, vector<8x128xf32>,
    } else {
    }
    %c2_i32_6 = arith.constant 2 : i32
    %13 = arith.cmpi eq, %arg1, %c2_i32_6 : i32
    %14 = arith.extui %13 : i1 to i32
    %c0_i32_7 = arith.constant 0 : i32
    %15 = arith.cmpi ne, %14, %c0_i32_7 : i32
    scf.if %15 {
      %c0_8 = arith.constant 0 : index
      %c0_9 = arith.constant 0 : index
      %16 = vector.load %arg12[%c0_8, %c0_9] : memref<8x128xf32, #tpu.memory_space<vmem>>, vector<8x128xf32>
      %cst = arith.constant 0.000000e+00 : f32
      %17 = vector.broadcast %cst : f32 to vector<8x128xf32>
      %18 = arith.maximumf %16, %17 : vector<8x128xf32>
      %c0_10 = arith.constant 0 : index
      %c0_11 = arith.constant 0 : index
      %19 = vector.load %arg5[%c0_10, %c0_11] : memref<128x128xf32, #tpu.memory_space<vmem>>, vector<128x128xf32>
      %cst_12 = arith.constant dense<0.000000e+00> : vector<8x128xf32>
      %20 = tpu.matmul %18, %19, %cst_12 {dimension_numbers = #tpu.dot_dimension_numbers<[1], [0], [0], [1], [0, 0, 1, 1], [], []>} : vector<8x128xf32>, vector<128x128xf32>, vector<8x128xf32> -> vector<8x128xf32>
      %c0_13 = arith.constant 0 : index
      %c0_14 = arith.constant 0 : index
      %21 = vector.load %arg6[%c0_13, %c0_14] : memref<1x128xf32, #tpu.memory_space<vmem>>, vector<1x128xf32>
      %22 = vector.broadcast %21 : vector<1x128xf32> to vector<8x128xf32>
      %23 = arith.addf %20, %22 : vector<8x128xf32>
      %cst_15 = arith.constant 0.000000e+00 : f32
      %24 = vector.broadcast %cst_15 : f32 to vector<8x128xf32>
      %25 = arith.maximumf %23, %24 : vector<8x128xf32>
      %c0_16 = arith.constant 0 : index
      %c0_17 = arith.constant 0 : index
      %26 = vector.load %arg7[%c0_16, %c0_17] : memref<128x128xf32, #tpu.memory_space<vmem>>, vector<128x128xf32>
      %cst_18 = arith.constant dense<0.000000e+00> : vector<8x128xf32>
      %27 = tpu.matmul %25, %26, %cst_18 {dimension_numbers = #tpu.dot_dimension_numbers<[1], [0], [0], [1], [0, 0, 1, 1], [], []>} : vector<8x128xf32>, vector<128x128xf32>, vector<8x128xf32> -> vector<8x128xf32>
      %c0_19 = arith.constant 0 : index
      %c0_20 = arith.constant 0 : index
      %28 = vector.load %arg8[%c0_19, %c0_20] : memref<1x128xf32, #tpu.memory_space<vmem>>, vector<1x128xf32>
      %29 = vector.broadcast %28 : vector<1x128xf32> to vector<8x128xf32>
      %30 = arith.addf %27, %29 : vector<8x128xf32>
      %cst_21 = arith.constant 0.000000e+00 : f32
      %31 = vector.broadcast %cst_21 : f32 to vector<8x128xf32>
      %32 = arith.maximumf %30, %31 : vector<8x128xf32>
      %c0_22 = arith.constant 0 : index
      %c0_23 = arith.constant 0 : index
      %33 = vector.load %arg9[%c0_22, %c0_23] : memref<128x128xf32, #tpu.memory_space<vmem>>, vector<128x128xf32>
      %cst_24 = arith.constant dense<0.000000e+00> : vector<8x128xf32>
      %34 = tpu.matmul %32, %33, %cst_24 {dimension_numbers = #tpu.dot_dimension_numbers<[1], [0], [0], [1], [0, 0, 1, 1], [], []>} : vector<8x128xf32>, vector<128x128xf32>, vector<8x128xf32> -> vector<8x128xf32>
      %c0_25 = arith.constant 0 : index
      %c0_26 = arith.constant 0 : index
      %35 = vector.load %arg10[%c0_25, %c0_26] : memref<1x128xf32, #tpu.memory_space<vmem>>, vector<1x128xf32>
      %36 = vector.broadcast %35 : vector<1x128xf32> to vector<8x128xf32>
      %37 = arith.addf %34, %36 : vector<8x128xf32>
      %c0_27 = arith.constant 0 : index
      %c0_28 = arith.constant 0 : index
      %38 = vector.load %arg11[%c0_27, %c0_28] : memref<8x128xf32, #tpu.memory_space<vmem>>, vector<8x128xf32>
      tpu.vector_store %arg11[%c0_27, %c0_28], %37 {strides = array<i32>} : memref<8x128xf32, #tpu.memory_space<vmem>>, vector<8x128xf32>,
    } else {
    }
    return
  }
  func.func @transform_0(%arg0: i32, %arg1: i32) -> (i32, i32, i32) {
    %c0_i32 = arith.constant 0 : i32
    %c0_i32_0 = arith.constant 0 : i32
    return %arg1, %arg0, %c0_i32 : i32, i32, i32
  }
  func.func @transform_1(%arg0: i32, %arg1: i32) -> (i32, i32) {
    %c0_i32 = arith.constant 0 : i32
    %c0_i32_0 = arith.constant 0 : i32
    %c0_i32_1 = arith.constant 0 : i32
    return %c0_i32, %c0_i32_0 : i32, i32
  }
  func.func @transform_2(%arg0: i32, %arg1: i32) -> (i32, i32) {
    %c0_i32 = arith.constant 0 : i32
    %c0_i32_0 = arith.constant 0 : i32
    %c0_i32_1 = arith.constant 0 : i32
    return %c0_i32, %c0_i32_0 : i32, i32
  }
  func.func @transform_3(%arg0: i32, %arg1: i32) -> (i32, i32) {
    %c0_i32 = arith.constant 0 : i32
    %c0_i32_0 = arith.constant 0 : i32
    %c0_i32_1 = arith.constant 0 : i32
    return %c0_i32, %c0_i32_0 : i32, i32
  }
  func.func @transform_4(%arg0: i32, %arg1: i32) -> (i32, i32) {
    %c0_i32 = arith.constant 0 : i32
    %c0_i32_0 = arith.constant 0 : i32
    %c0_i32_1 = arith.constant 0 : i32
    return %c0_i32, %c0_i32_0 : i32, i32
  }
  func.func @transform_5(%arg0: i32, %arg1: i32) -> (i32, i32) {
    %c0_i32 = arith.constant 0 : i32
    %c0_i32_0 = arith.constant 0 : i32
    %c0_i32_1 = arith.constant 0 : i32
    return %c0_i32, %c0_i32_0 : i32, i32
  }
  func.func @transform_6(%arg0: i32, %arg1: i32) -> (i32, i32) {
    %c0_i32 = arith.constant 0 : i32
    %c0_i32_0 = arith.constant 0 : i32
    %c0_i32_1 = arith.constant 0 : i32
    return %c0_i32, %c0_i32_0 : i32, i32
  }
  func.func @transform_7(%arg0: i32, %arg1: i32) -> (i32, i32) {
    %c0_i32 = arith.constant 0 : i32
    %c0_i32_0 = arith.constant 0 : i32
    %c0_i32_1 = arith.constant 0 : i32
    return %c0_i32, %c0_i32_0 : i32, i32
  }
  func.func @transform_8(%arg0: i32, %arg1: i32) -> (i32, i32) {
    %c0_i32 = arith.constant 0 : i32
    %c0_i32_0 = arith.constant 0 : i32
    %c0_i32_1 = arith.constant 0 : i32
    return %c0_i32, %c0_i32_0 : i32, i32
  }
  func.func @transform_9(%arg0: i32, %arg1: i32) -> (i32, i32) {
    %c0_i32 = arith.constant 0 : i32
    %c0_i32_0 = arith.constant 0 : i32
    return %arg0, %c0_i32 : i32, i32
  }
}

</mosaic_0001>

<bundles_post_ra>
// kernel: chen21rnn_forward.1
= control target key start
LH: loop header
LB: loop body
LE: loop exit
PB: predicated region body
PF: predicated region fallthrough
CT: control target
= control target key end

     0   :  { %s1182_s30 = smov 0   ;;  %s1184_s10 = smov 0   ;;  %s1899_s0 = inlined_call_operand.vmem [shape: f32[9,8,384], index: 0, kind: input, shape index: {}]   ;;  %s1900_s1 = inlined_call_operand.vmem [shape: f32[128,384], index: 1, kind: input, shape index: {}]   ;;  %s1901_s2 = inlined_call_operand.vmem [shape: f32[1,128], index: 2, kind: input, shape index: {}]   ;;  %s1902_s3 = inlined_call_operand.vmem [shape: f32[128,128], index: 3, kind: input, shape index: {}]   ;;  %s1903_s4 = inlined_call_operand.vmem [shape: f32[1,128], index: 4, kind: input, shape index: {}]   ;;  %s1904_s5 = inlined_call_operand.vmem [shape: f32[128,128], index: 5, kind: input, shape index: {}]   ;;  %s1905_s6 = inlined_call_operand.vmem [shape: f32[1,128], index: 6, kind: input, shape index: {}]   ;;  %s1906_s7 = inlined_call_operand.vmem [shape: f32[128,128], index: 7, kind: input, shape index: {}]   ;;  %s1907_s8 = inlined_call_operand.vmem [shape: f32[1,128], index: 8, kind: input, shape index: {}]   ;;  %s1908_s9 = inlined_call_operand.vmem [shape: f32[8,128], index: 9, kind: output, shape index: {}]  }
   0x1   :  { %s1186_s11 = smov 0  }
   0x2 LB: > { %s28_s12 = sadd.s32 1, %s1125_s10  ;;  %p1030_p0 = scmp.ge.s32.totalorder %s1129_s11, 1  ;;  %s1129_s11 = sphi %s1186_s11, %s19_s11   ;;  %s1125_s10 = sphi %s1184_s10, %s1930_s10   ;;  %s1121_s30 = sphi %s1182_s30, %s1929_s30  }
   0x3   : > { %p29_p1 = scmp.ge.s32.totalorder %s28_s12, 3  ;;  %p307_p2 = scmp.lt.s32.totalorder %s1129_s11, 4 }
   0x5   : > { %s1932_s12 = smov (%p29_p1, %s28_s12), 0  ;;  %p308_p3 = pnand %p1030_p0, %p307_p2 }
   0x7   : > { %311 = sbr.rel (%p308_p3) target bundleno = 1320 (0x528), region = 56 }
   0xc   : > { %s347_s13 = smul.u32 3, %s1121_s30  ;;  %p1032_p5 = scmp.ne.s32.totalorder %s1121_s30, 0 }
   0xe   : > { %p348_p4 = scmp.lt.s32.totalorder %s347_s13, 8 }
   0xf   : > { %365 = sbr.rel (%p1032_p5) target bundleno = 22 (0x16), region = 60 }
  0x10   : > { %s1934_s13 = smov (!%p348_p4, %s347_s13), 8 }
  0x11   : > { %s1047_s14 = smul.u32 24, %s1934_s13 }
  0x13   : > { %s1206_s17 = scalar_lea.vmem %s1899_s0, %s1047_s14 }
  0x14   : > { %v1131_v0 = vmov 0.0  }
  0x15   : > { %366 = vst [vmem:[#allocation2] sm:$0xff] %v1131_v0 }
  0x16 PF: > { %v1212_v1 = vld [vmem:[%s1900_s1] sm:$0xff]  ;;  %v1217_v2 = vld [vmem:[%s1900_s1 + $0x8] sm:$0xff]  ;;  %v1222_v3 = vld [vmem:[%s1900_s1 + $0x10] sm:$0xff]  ;;  %p1033_p6 = scmp.eq.s32.totalorder %s1121_s30, 2 }
  0x17   : > { %1919 = vst [vmem:[#allocation3_spill] sm:$0xff] %v1212_v1  ;;  %v1227_v4 = vld [vmem:[%s1900_s1 + $0x18] sm:$0xff]  ;;  %v1232_v5 = vld [vmem:[%s1900_s1 + $0x20] sm:$0xff]  ;;  %v1237_v6 = vld [vmem:[%s1900_s1 + $0x28] sm:$0xff] }
  0x18   : > { %1920 = vst [vmem:[#allocation4_spill] sm:$0xff] %v1217_v2  ;;  %v1242_v7 = vld [vmem:[%s1900_s1 + $0x30] sm:$0xff]  ;;  %v1247_v8 = vld [vmem:[%s1900_s1 + $0x38] sm:$0xff]  ;;  %v1252_v9 = vld [vmem:[%s1900_s1 + $0x40] sm:$0xff] }
  0x19   : > { %1921 = vst [vmem:[#allocation5_spill] sm:$0xff] %v1222_v3  ;;  %v1257_v10 = vld [vmem:[%s1900_s1 + $0x48] sm:$0xff]  ;;  %v1262_v11 = vld [vmem:[%s1900_s1 + $0x50] sm:$0xff]  ;;  %v1267_v12 = vld [vmem:[%s1900_s1 + $0x58] sm:$0xff] }
  0x1a   : > { %1922 = vst [vmem:[#allocation6_spill] sm:$0xff] %v1232_v5  ;;  %v1272_v13 = vld [vmem:[%s1900_s1 + $0x60] sm:$0xff]  ;;  %v1277_v14 = vld [vmem:[%s1900_s1 + $0x68] sm:$0xff]  ;;  %v1282_v15 = vld [vmem:[%s1900_s1 + $0x70] sm:$0xff] }
  0x1b   : > { %1923 = vst [vmem:[#allocation7_spill] sm:$0xff] %v1237_v6  ;;  %v1287_v16 = vld [vmem:[%s1900_s1 + $0x78] sm:$0xff]  ;;  %v1292_v17 = vld [vmem:[%s1900_s1 + $0x80] sm:$0xff]  ;;  %v1297_v18 = vld [vmem:[%s1900_s1 + $0x88] sm:$0xff] }
  0x1c   : > { %v1302_v19 = vld [vmem:[%s1900_s1 + $0x90] sm:$0xff]  ;;  %v1307_v20 = vld [vmem:[%s1900_s1 + $0x98] sm:$0xff]  ;;  %v1312_v21 = vld [vmem:[%s1900_s1 + $0xa0] sm:$0xff] }
  0x1d   : > { %v1317_v22 = vld [vmem:[%s1900_s1 + $0xa8] sm:$0xff]  ;;  %v1322_v23 = vld [vmem:[%s1900_s1 + $0xb0] sm:$0xff]  ;;  %v1327_v24 = vld [vmem:[%s1900_s1 + $0xb8] sm:$0xff] }
  0x1e   : > { %v1332_v25 = vld [vmem:[%s1900_s1 + $0xc0] sm:$0xff]  ;;  %v1337_v26 = vld [vmem:[%s1900_s1 + $0xc8] sm:$0xff]  ;;  %v1342_v27 = vld [vmem:[%s1900_s1 + $0xd0] sm:$0xff] }
  0x1f   : > { %v1347_v28 = vld [vmem:[%s1900_s1 + $0xd8] sm:$0xff]  ;;  %v1352_v29 = vld [vmem:[%s1900_s1 + $0xe0] sm:$0xff]  ;;  %v1357_v30 = vld [vmem:[%s1900_s1 + $0xe8] sm:$0xff] }
  0x20   : > { %v1362_v31 = vld [vmem:[%s1900_s1 + $0xf0] sm:$0xff]  ;;  %v1367_v32 = vld [vmem:[%s1900_s1 + $0xf8] sm:$0xff]  ;;  %v1372_v33 = vld [vmem:[%s1900_s1 + $0x100] sm:$0xff] }
  0x21   : > { %v1377_v34 = vld [vmem:[%s1900_s1 + $0x108] sm:$0xff]  ;;  %v1382_v35 = vld [vmem:[%s1900_s1 + $0x110] sm:$0xff]  ;;  %v1387_v36 = vld [vmem:[%s1900_s1 + $0x118] sm:$0xff] }
  0x22   : > { %v1392_v37 = vld [vmem:[%s1900_s1 + $0x120] sm:$0xff]  ;;  %v1397_v38 = vld [vmem:[%s1900_s1 + $0x128] sm:$0xff]  ;;  %v1402_v39 = vld [vmem:[%s1900_s1 + $0x130] sm:$0xff]  ;;  %423 = sbr.rel (%p1033_p6) target bundleno = 557 (0x22d), region = 64 }
  0x23   : > { %v1407_v40 = vld [vmem:[%s1900_s1 + $0x138] sm:$0xff]  ;;  %v1412_v41 = vld [vmem:[%s1900_s1 + $0x140] sm:$0xff]  ;;  %v1417_v42 = vld [vmem:[%s1900_s1 + $0x148] sm:$0xff] }
  0x24   : > { %v1422_v43 = vld [vmem:[%s1900_s1 + $0x150] sm:$0xff]  ;;  %v1427_v44 = vld [vmem:[%s1900_s1 + $0x158] sm:$0xff]  ;;  %v1432_v45 = vld [vmem:[%s1900_s1 + $0x160] sm:$0xff] }
  0x25   : > { %v1437_v46 = vld [vmem:[%s1900_s1 + $0x168] sm:$0xff]  ;;  %v1442_v47 = vld [vmem:[%s1900_s1 + $0x170] sm:$0xff]  ;;  %v1447_v48 = vld [vmem:[%s1900_s1 + $0x178] sm:$0xff] }
  0x26   : > { %v1452_v49 = vld [vmem:[%s1901_s2] ss:$0 sm:$0xff] }
  0x27   : > { %428 = vmatpush.msra.mxu0 %v1437_v46  ;;  %468 = vmatpush.msra.mxu2 %v1447_v48  ;;  %v1512_v50 = vld [vmem:[#allocation2] sm:$0xff]  ;;  %v426_v54 = vld [vmem:[%s1206_s17 + $0x8] sm:$0xff]  ;;  %v427_v0 = vld [vmem:[%s1206_s17 + $0x10] sm:$0xff] }
  0x28   : > { %448 = vmatpush.msra.mxu1 %v1442_v47  ;;  %509 = vmatpush.msra.mxu3 %v1437_v46  ;;  %v425_v51 = vld [vmem:[%s1206_s17] sm:$0xff] }
  0x29   : > { %429 = vmatpush.msra.mxu0 %v1422_v43  ;;  %469 = vmatpush.msra.mxu2 %v1432_v45 }
  0x2a   : > { %449 = vmatpush.msra.mxu1 %v1427_v44  ;;  %510 = vmatpush.msra.mxu3 %v1422_v43 }
  0x2b   : > { %430 = vmatpush.msra.mxu0 %v1407_v40  ;;  %470 = vmatpush.msra.mxu2 %v1417_v42 }
  0x2c   : > { %450 = vmatpush.msra.mxu1 %v1412_v41  ;;  %511 = vmatpush.msra.mxu3 %v1407_v40 }
  0x2d   : > { %431 = vmatpush.msra.mxu0 %v1392_v37  ;;  %471 = vmatpush.msra.mxu2 %v1402_v39 }
  0x2e   : > { %451 = vmatpush.msra.mxu1 %v1397_v38  ;;  %512 = vmatpush.msra.mxu3 %v1392_v37 }
  0x2f   : > { %432 = vmatpush.msra.mxu0 %v1377_v34  ;;  %472 = vmatpush.msra.mxu2 %v1387_v36 }
  0x30   : > { %452 = vmatpush.msra.mxu1 %v1382_v35  ;;  %513 = vmatpush.msra.mxu3 %v1377_v34 }
  0x31   : > { %433 = vmatpush.msra.mxu0 %v1362_v31  ;;  %473 = vmatpush.msra.mxu2 %v1372_v33 }
  0x32   : > { %453 = vmatpush.msra.mxu1 %v1367_v32  ;;  %514 = vmatpush.msra.mxu3 %v1362_v31 }
  0x33   : > { %434 = vmatpush.msra.mxu0 %v1347_v28  ;;  %474 = vmatpush.msra.mxu2 %v1357_v30 }
  0x34   : > { %454 = vmatpush.msra.mxu1 %v1352_v29  ;;  %515 = vmatpush.msra.mxu3 %v1347_v28 }
  0x35   : > { %435 = vmatpush.msra.mxu0 %v1332_v25  ;;  %475 = vmatpush.msra.mxu2 %v1342_v27 }
  0x36   : > { %455 = vmatpush.msra.mxu1 %v1337_v26  ;;  %516 = vmatpush.msra.mxu3 %v1332_v25 }
  0x37   : > { %436 = vmatpush.msra.mxu0 %v1317_v22  ;;  %476 = vmatpush.msra.mxu2 %v1327_v24 }
  0x38   : > { %456 = vmatpush.msra.mxu1 %v1322_v23  ;;  %517 = vmatpush.msra.mxu3 %v1317_v22 }
  0x39   : > { %437 = vmatpush.msra.mxu0 %v1302_v19  ;;  %477 = vmatpush.msra.mxu2 %v1312_v21 }
  0x3a   : > { %457 = vmatpush.msra.mxu1 %v1307_v20  ;;  %518 = vmatpush.msra.mxu3 %v1302_v19 }
  0x3b   : > { %438 = vmatpush.msra.mxu0 %v1287_v16  ;;  %478 = vmatpush.msra.mxu2 %v1297_v18 }
  0x3c   : > { %458 = vmatpush.msra.mxu1 %v1292_v17  ;;  %519 = vmatpush.msra.mxu3 %v1287_v16 }
  0x3d   : > { %439 = vmatpush.msra.mxu0 %v1272_v13  ;;  %479 = vmatpush.msra.mxu2 %v1282_v15 }
  0x3e   : > { %459 = vmatpush.msra.mxu1 %v1277_v14  ;;  %520 = vmatpush.msra.mxu3 %v1272_v13 }
  0x3f   : > { %440 = vmatpush.msra.mxu0 %v1257_v10  ;;  %480 = vmatpush.msra.mxu2 %v1267_v12 }
  0x40   : > { %460 = vmatpush.msra.mxu1 %v1262_v11  ;;  %521 = vmatpush.msra.mxu3 %v1257_v10 }
  0x41   : > { %441 = vmatpush.msra.mxu0 %v1242_v7  ;;  %481 = vmatpush.msra.mxu2 %v1252_v9 }
  0x42   : > { %461 = vmatpush.msra.mxu1 %v1247_v8  ;;  %522 = vmatpush.msra.mxu3 %v1242_v7 }
  0x43   : > { %442 = vmatpush.msra.mxu0 %v1227_v4  ;;  %482 = vmatpush.msra.mxu2 %v1237_v6 }
  0x44   : > { %462 = vmatpush.msra.mxu1 %v1232_v5  ;;  %523 = vmatpush.msra.mxu3 %v1227_v4 }
  0x45   : > { %443 = vmatpush.msra.mxu0 %v1212_v1  ;;  %483 = vmatpush.msra.mxu2 %v1222_v3 }
  0x46   : > { %444 = vmatmul.f32.vlgmr.msra.gmra.mxu0 %v1512_v50  ;;  %484 = vmatmul.f32.vlgmr.msra.gmra.mxu2 %v1512_v50 }
  0x47   : > { %463 = vmatpush.msra.mxu1 %v1217_v2  ;;  %529 = vmatpush.msrb.mxu0 %v1442_v47 }
  0x48   : > { %464 = vmatmul.f32.vlgmr.msra.gmra.mxu1 %v1512_v50  ;;  %524 = vmatpush.msra.mxu3 %v1212_v1 }
  0x49   : > { %549 = vmatpush.msrb.mxu1 %v1447_v48  ;;  %530 = vmatpush.msrb.mxu0 %v1427_v44 }
  0x4a   : > { %590 = vmatpush.msrb.mxu2 %v1437_v46  ;;  %610 = vmatpush.msrb.mxu3 %v1442_v47 }
  0x4b   : > { %550 = vmatpush.msrb.mxu1 %v1432_v45  ;;  %531 = vmatpush.msrb.mxu0 %v1412_v41 }
  0x4c   : > { %591 = vmatpush.msrb.mxu2 %v1422_v43  ;;  %611 = vmatpush.msrb.mxu3 %v1427_v44 }
  0x4d   : > { %551 = vmatpush.msrb.mxu1 %v1417_v42  ;;  %532 = vmatpush.msrb.mxu0 %v1397_v38 }
  0x4e   : > { %592 = vmatpush.msrb.mxu2 %v1407_v40  ;;  %612 = vmatpush.msrb.mxu3 %v1412_v41 }
  0x4f   : > { %552 = vmatpush.msrb.mxu1 %v1402_v39  ;;  %533 = vmatpush.msrb.mxu0 %v1382_v35 }
  0x50   : > { %593 = vmatpush.msrb.mxu2 %v1392_v37  ;;  %613 = vmatpush.msrb.mxu3 %v1397_v38 }
  0x51   : > { %553 = vmatpush.msrb.mxu1 %v1387_v36  ;;  %534 = vmatpush.msrb.mxu0 %v1367_v32 }
  0x52   : > { %594 = vmatpush.msrb.mxu2 %v1377_v34  ;;  %614 = vmatpush.msrb.mxu3 %v1382_v35 }
  0x53   : > { %554 = vmatpush.msrb.mxu1 %v1372_v33  ;;  %535 = vmatpush.msrb.mxu0 %v1352_v29 }
  0x54   : > { %595 = vmatpush.msrb.mxu2 %v1362_v31  ;;  %615 = vmatpush.msrb.mxu3 %v1367_v32 }
  0x55   : > { %555 = vmatpush.msrb.mxu1 %v1357_v30  ;;  %536 = vmatpush.msrb.mxu0 %v1337_v26 }
  0x56   : > { %596 = vmatpush.msrb.mxu2 %v1347_v28  ;;  %616 = vmatpush.msrb.mxu3 %v1352_v29 }
  0x57   : > { %556 = vmatpush.msrb.mxu1 %v1342_v27  ;;  %537 = vmatpush.msrb.mxu0 %v1322_v23 }
  0x58   : > { %597 = vmatpush.msrb.mxu2 %v1332_v25  ;;  %617 = vmatpush.msrb.mxu3 %v1337_v26 }
  0x59   : > { %557 = vmatpush.msrb.mxu1 %v1327_v24  ;;  %538 = vmatpush.msrb.mxu0 %v1307_v20 }
  0x5a   : > { %598 = vmatpush.msrb.mxu2 %v1317_v22  ;;  %618 = vmatpush.msrb.mxu3 %v1322_v23 }
  0x5b   : > { %558 = vmatpush.msrb.mxu1 %v1312_v21  ;;  %539 = vmatpush.msrb.mxu0 %v1292_v17 }
  0x5c   : > { %599 = vmatpush.msrb.mxu2 %v1302_v19  ;;  %619 = vmatpush.msrb.mxu3 %v1307_v20 }
  0x5d   : > { %559 = vmatpush.msrb.mxu1 %v1297_v18  ;;  %540 = vmatpush.msrb.mxu0 %v1277_v14 }
  0x5e   : > { %600 = vmatpush.msrb.mxu2 %v1287_v16  ;;  %620 = vmatpush.msrb.mxu3 %v1292_v17 }
  0x5f   : > { %560 = vmatpush.msrb.mxu1 %v1282_v15  ;;  %541 = vmatpush.msrb.mxu0 %v1262_v11 }
  0x60   : > { %601 = vmatpush.msrb.mxu2 %v1272_v13  ;;  %621 = vmatpush.msrb.mxu3 %v1277_v14 }
  0x61   : > { %561 = vmatpush.msrb.mxu1 %v1267_v12  ;;  %542 = vmatpush.msrb.mxu0 %v1247_v8 }
  0x62   : > { %602 = vmatpush.msrb.mxu2 %v1257_v10  ;;  %622 = vmatpush.msrb.mxu3 %v1262_v11 }
  0x63   : > { %562 = vmatpush.msrb.mxu1 %v1252_v9  ;;  %543 = vmatpush.msrb.mxu0 %v1232_v5 }
  0x64   : > { %603 = vmatpush.msrb.mxu2 %v1242_v7  ;;  %623 = vmatpush.msrb.mxu3 %v1247_v8 }
  0x65   : > { %563 = vmatpush.msrb.mxu1 %v1237_v6  ;;  %544 = vmatpush.msrb.mxu0 %v1217_v2 }
  0x66   : > { %604 = vmatpush.msrb.mxu2 %v1227_v4  ;;  %624 = vmatpush.msrb.mxu3 %v1232_v5 }
  0x67   : > { %630 = vmatpush.msra.mxu0 %v1447_v48  ;;  %564 = vmatpush.msrb.mxu1 %v1222_v3 }
  0x68   : > { %605 = vmatpush.msrb.mxu2 %v1212_v1  ;;  %625 = vmatpush.msrb.mxu3 %v1217_v2 }
  0x69   : > { %631 = vmatpush.msra.mxu0 %v1432_v45 }
  0x6b   : > { %632 = vmatpush.msra.mxu0 %v1417_v42 }
  0x6d   : > { %633 = vmatpush.msra.mxu0 %v1402_v39 }
  0x6f   : > { %634 = vmatpush.msra.mxu0 %v1387_v36 }
  0x71   : > { %635 = vmatpush.msra.mxu0 %v1372_v33 }
  0x73   : > { %636 = vmatpush.msra.mxu0 %v1357_v30 }
  0x75   : > { %637 = vmatpush.msra.mxu0 %v1342_v27 }
  0x77   : > { %638 = vmatpush.msra.mxu0 %v1327_v24 }
  0x79   : > { %639 = vmatpush.msra.mxu0 %v1312_v21 }
  0x7b   : > { %640 = vmatpush.msra.mxu0 %v1297_v18 }
  0x7d   : > { %641 = vmatpush.msra.mxu0 %v1282_v15 }
  0x7f   : > { %642 = vmatpush.msra.mxu0 %v1267_v12 }
  0x81   : > { %643 = vmatpush.msra.mxu0 %v1252_v9 }
  0x83   : > { %644 = vmatpush.msra.mxu0 %v1237_v6 }
  0x85   : > { %645 = vmatpush.msra.mxu0 %v1222_v3 }
  0xc3   : > { %v445_v52 = vpop.f32.mrf.mxu0 }
  0xc4   : > { %v488_v53 = vadd.f32 %v445_v52, %v425_v51 }
  0xc5   : > { %v465_v55 = vpop.f32.mrf.mxu1 }
  0xc6   : > { %v489_v56 = vmul.f32 0.5, %v488_v53  ;;  %v493_v57 = vadd.f32 %v465_v55, %v426_v54 }
  0xc8   : > { %1074 = vtanh.f32 %v489_v56  ;;  %v494_v58 = vmul.f32 0.5, %v493_v57  ;;  %v1034_v57 = vld [vmem:[%s1206_s17 + $0x18] sm:$0xff] }
  0xc9   : > { %v485_v59 = vpop.f32.mrf.mxu2 }
  0xca   : > { %1076 = vtanh.f32 %v494_v58  ;;  %v498_v62 = vadd.f32 %v1452_v49, %v485_v59 }
  0xce   : > { %v1075_v60 = vpop.eup %1074 }
  0xcf   : > { %v491_v61 = vmul.f32 0.5, %v1075_v60  ;;  %v1035_v60 = vld [vmem:[%s1206_s17 + $0x20] sm:$0xff] }
  0xd0   : > { %v1077_v3 = vpop.eup %1076 }
  0xd1   : > { %v492_v63 = vadd.f32 0.5, %v491_v61  ;;  %v496_v51 = vmul.f32 0.5, %v1077_v3 }
  0xd3   : > { %v499_v2 = vmul.f32 %v498_v62, %v492_v63  ;;  %v497_v52 = vadd.f32 0.5, %v496_v51 }
  0xd5   : > { %v500_v1 = vadd.f32 %v499_v2, %v427_v0 }
  0xd7   : > { %1078 = vtanh.f32 %v500_v1 }
  0xdd   : > { %v1079_v53 = vpop.eup %1078 }
  0xde   : > { %v502_v54 = vsub.f32 %v1512_v50, %v1079_v53 }
  0xe0   : > { %v503_v55 = vmul.f32 %v502_v54, %v497_v52  ;;  %v1036_v52 = vld [vmem:[%s1206_s17 + $0x28] sm:$0xff] }
  0xe2   : > { %v504_v56 = vadd.f32 %v1079_v53, %v503_v55 }
  0xe4   : > { %525 = vmatmul.f32.vlgmr.msra.gmra.mxu3 %v504_v56  ;;  %545 = vmatmul.f32.vlgmr.msrb.gmra.mxu0 %v504_v56 }
  0xe5   : > { %565 = vmatmul.f32.vlgmr.msrb.gmra.mxu1 %v504_v56 }
 0x161   : > { %v546_v61 = vpop.f32.mrf.mxu0 }
 0x162   : > { %v574_v2 = vadd.f32 %v1035_v60, %v546_v61  ;;  %v566_v63 = vpop.f32.mrf.mxu1 }
 0x163   : > { %v579_v50 = vadd.f32 %v1452_v49, %v566_v63 }
 0x164   : > { %v575_v1 = vmul.f32 0.5, %v574_v2  ;;  %v1037_v2 = vld [vmem:[%s1206_s17 + $0x30] sm:$0xff] }
 0x167   : > { %v526_v58 = vpop.f32.mrf.mxu3 }
 0x168   : > { %v569_v59 = vadd.f32 %v1034_v57, %v526_v58 }
 0x16a   : > { %v570_v62 = vmul.f32 0.5, %v569_v59 }
 0x16c   : > { %1080 = vtanh.f32 %v570_v62 }
 0x16d   : > { %1082 = vtanh.f32 %v575_v1 }
 0x172   : > { %v1081_v3 = vpop.eup %1080 }
 0x173   : > { %v572_v0 = vmul.f32 0.5, %v1081_v3  ;;  %v1083_v55 = vpop.eup %1082 }
 0x174   : > { %v577_v57 = vmul.f32 0.5, %v1083_v55 }
 0x175   : > { %v573_v51 = vadd.f32 0.5, %v572_v0  ;;  %v1038_v0 = vld [vmem:[%s1206_s17 + $0x38] sm:$0xff] }
 0x176   : > { %v578_v59 = vadd.f32 0.5, %v577_v57 }
 0x177   : > { %v580_v53 = vmul.f32 %v579_v50, %v573_v51 }
 0x179   : > { %v581_v54 = vadd.f32 %v1036_v52, %v580_v53 }
 0x17b   : > { %1084 = vtanh.f32 %v581_v54 }
 0x181   : > { %v1085_v58 = vpop.eup %1084 }
 0x182   : > { %v583_v62 = vsub.f32 %v504_v56, %v1085_v58 }
 0x184   : > { %v584_v60 = vmul.f32 %v583_v62, %v578_v59 }
 0x186   : > { %v585_v61 = vadd.f32 %v1085_v58, %v584_v60  ;;  %v1039_v58 = vld [vmem:[%s1206_s17 + $0x40] sm:$0xff] }
 0x188   : > { %606 = vmatmul.f32.vlgmr.msrb.gmra.mxu2 %v585_v61  ;;  %626 = vmatmul.f32.vlgmr.msrb.gmra.mxu3 %v585_v61 }
 0x189   : > { %646 = vmatmul.f32.vlgmr.msra.gmra.mxu0 %v585_v61 }
 0x206   : > { %v647_v54 = vpop.f32.mrf.mxu0 }
 0x207   : > { %v660_v56 = vadd.f32 %v1452_v49, %v647_v54 }
 0x20b   : > { %v607_v1 = vpop.f32.mrf.mxu2  ;;  %v627_v50 = vpop.f32.mrf.mxu3 }
 0x20c   : > { %v650_v3 = vadd.f32 %v1037_v2, %v607_v1  ;;  %v655_v51 = vadd.f32 %v1038_v0, %v627_v50 }
 0x20e   : > { %v651_v63 = vmul.f32 0.5, %v650_v3  ;;  %v656_v52 = vmul.f32 0.5, %v655_v51 }
 0x210   : > { %1086 = vtanh.f32 %v651_v63 }
 0x211   : > { %1088 = vtanh.f32 %v656_v52 }
 0x216   : > { %v1087_v53 = vpop.eup %1086 }
 0x217   : > { %v653_v55 = vmul.f32 0.5, %v1087_v53  ;;  %v1089_v60 = vpop.eup %1088 }
 0x218   : > { %v658_v5 = vmul.f32 0.5, %v1089_v60 }
 0x219   : > { %v654_v57 = vadd.f32 0.5, %v653_v55 }
 0x21a   : > { %v659_v1 = vadd.f32 0.5, %v658_v5 }
 0x21b   : > { %v661_v59 = vmul.f32 %v660_v56, %v654_v57 }
 0x21d   : > { %v662_v62 = vadd.f32 %v1039_v58, %v661_v59 }
 0x21f   : > { %1090 = vtanh.f32 %v662_v62 }
 0x225   : > { %v1091_v2 = vpop.eup %1090 }
 0x226   : > { %v664_v3 = vsub.f32 %v585_v61, %v1091_v2 }
 0x228   : > { %v665_v6 = vmul.f32 %v664_v3, %v659_v1 }
 0x22a   : > { %v666_v63 = vadd.f32 %v1091_v2, %v665_v6 }
 0x22c   : > { %667 = vst [vmem:[#allocation2] sm:$0xff] %v666_v63 }
 0x22d PF: > { %p1040_p7 = scmp.ne.s32.totalorder %s1121_s30, 2 }
 0x22f   : > { %670 = sbr.rel (%p1040_p7) target bundleno = 1320 (0x528), region = 68 }
 0x234   : > { %675 = vmatpush.msra.mxu0 %v1437_v46  ;;  %715 = vmatpush.msra.mxu2 %v1447_v48  ;;  %v1675_v5 = vld [vmem:[#allocation2] sm:$0xff]  ;;  %v1924_v6 = vld [vmem:[#allocation7_spill] sm:$0xff]  ;;  %v892_v54 = vld [vmem:[%s1904_s5 + $0x78] sm:$0xff] }
 0x235   : > { %695 = vmatpush.msra.mxu1 %v1442_v47  ;;  %756 = vmatpush.msra.mxu3 %v1437_v46  ;;  %v1041_v46 = vld [vmem:[%s1206_s17 + $0x18] sm:$0xff]  ;;  %v837_v61 = vld [vmem:[%s1902_s3 + $0x8] sm:$0xff]  ;;  %v836_v50 = vld [vmem:[%s1902_s3] sm:$0xff] }
 0x236   : > { %676 = vmatpush.msra.mxu0 %v1422_v43  ;;  %716 = vmatpush.msra.mxu2 %v1432_v45  ;;  %v1042_v51 = vld [vmem:[%s1206_s17 + $0x20] sm:$0xff]  ;;  %v891_v55 = vld [vmem:[%s1904_s5 + $0x70] sm:$0xff]  ;;  %v890_v56 = vld [vmem:[%s1904_s5 + $0x68] sm:$0xff] }
 0x237   : > { %696 = vmatpush.msra.mxu1 %v1427_v44  ;;  %757 = vmatpush.msra.mxu3 %v1422_v43  ;;  %v841_v43 = vld [vmem:[%s1902_s3 + $0x28] sm:$0xff]  ;;  %v889_v58 = vld [vmem:[%s1904_s5 + $0x60] sm:$0xff]  ;;  %v888_v59 = vld [vmem:[%s1904_s5 + $0x58] sm:$0xff] }
 0x238   : > { %677 = vmatpush.msra.mxu0 %v1407_v40  ;;  %717 = vmatpush.msra.mxu2 %v1417_v42  ;;  %v887_v1 = vld [vmem:[%s1904_s5 + $0x50] sm:$0xff]  ;;  %v886_v63 = vld [vmem:[%s1904_s5 + $0x48] sm:$0xff] }
 0x239   : > { %697 = vmatpush.msra.mxu1 %v1412_v41  ;;  %758 = vmatpush.msra.mxu3 %v1407_v40  ;;  %v844_v40 = vld [vmem:[%s1902_s3 + $0x40] sm:$0xff] }
 0x23a   : > { %678 = vmatpush.msra.mxu0 %v1392_v37  ;;  %718 = vmatpush.msra.mxu2 %v1402_v39 }
 0x23b   : > { %698 = vmatpush.msra.mxu1 %v1397_v38  ;;  %759 = vmatpush.msra.mxu3 %v1392_v37  ;;  %v847_v37 = vld [vmem:[%s1902_s3 + $0x58] sm:$0xff] }
 0x23c   : > { %679 = vmatpush.msra.mxu0 %v1377_v34  ;;  %719 = vmatpush.msra.mxu2 %v1387_v36 }
 0x23d   : > { %699 = vmatpush.msra.mxu1 %v1382_v35  ;;  %760 = vmatpush.msra.mxu3 %v1377_v34  ;;  %v850_v34 = vld [vmem:[%s1902_s3 + $0x70] sm:$0xff] }
 0x23e   : > { %680 = vmatpush.msra.mxu0 %v1362_v31  ;;  %720 = vmatpush.msra.mxu2 %v1372_v33 }
 0x23f   : > { %700 = vmatpush.msra.mxu1 %v1367_v32  ;;  %761 = vmatpush.msra.mxu3 %v1362_v31 }
 0x240   : > { %681 = vmatpush.msra.mxu0 %v1347_v28  ;;  %721 = vmatpush.msra.mxu2 %v1357_v30 }
 0x241   : > { %701 = vmatpush.msra.mxu1 %v1352_v29  ;;  %762 = vmatpush.msra.mxu3 %v1347_v28 }
 0x242   : > { %682 = vmatpush.msra.mxu0 %v1332_v25  ;;  %722 = vmatpush.msra.mxu2 %v1342_v27 }
 0x243   : > { %702 = vmatpush.msra.mxu1 %v1337_v26  ;;  %763 = vmatpush.msra.mxu3 %v1332_v25 }
 0x244   : > { %683 = vmatpush.msra.mxu0 %v1317_v22  ;;  %723 = vmatpush.msra.mxu2 %v1327_v24 }
 0x245   : > { %703 = vmatpush.msra.mxu1 %v1322_v23  ;;  %764 = vmatpush.msra.mxu3 %v1317_v22 }
 0x246   : > { %684 = vmatpush.msra.mxu0 %v1302_v19  ;;  %724 = vmatpush.msra.mxu2 %v1312_v21 }
 0x247   : > { %704 = vmatpush.msra.mxu1 %v1307_v20  ;;  %765 = vmatpush.msra.mxu3 %v1302_v19  ;;  %v1928_v19 = vld [vmem:[#allocation4_spill] sm:$0xff] }
 0x248   : > { %685 = vmatpush.msra.mxu0 %v1287_v16  ;;  %725 = vmatpush.msra.mxu2 %v1297_v18 }
 0x249   : > { %705 = vmatpush.msra.mxu1 %v1292_v17  ;;  %766 = vmatpush.msra.mxu3 %v1287_v16  ;;  %v1926_v16 = vld [vmem:[#allocation3_spill] sm:$0xff] }
 0x24a   : > { %686 = vmatpush.msra.mxu0 %v1272_v13  ;;  %726 = vmatpush.msra.mxu2 %v1282_v15 }
 0x24b   : > { %706 = vmatpush.msra.mxu1 %v1277_v14  ;;  %767 = vmatpush.msra.mxu3 %v1272_v13  ;;  %v1925_v13 = vld [vmem:[#allocation6_spill] sm:$0xff] }
 0x24c   : > { %687 = vmatpush.msra.mxu0 %v1257_v10  ;;  %727 = vmatpush.msra.mxu2 %v1267_v12 }
 0x24d   : > { %707 = vmatpush.msra.mxu1 %v1262_v11  ;;  %768 = vmatpush.msra.mxu3 %v1257_v10  ;;  %v1927_v10 = vld [vmem:[#allocation5_spill] sm:$0xff] }
 0x24e   : > { %688 = vmatpush.msra.mxu0 %v1242_v7  ;;  %728 = vmatpush.msra.mxu2 %v1252_v9 }
 0x24f   : > { %708 = vmatpush.msra.mxu1 %v1247_v8  ;;  %769 = vmatpush.msra.mxu3 %v1242_v7 }
 0x250   : > { %689 = vmatpush.msra.mxu0 %v1227_v4  ;;  %729 = vmatpush.msra.mxu2 %v1924_v6 }
 0x251   : > { %709 = vmatpush.msra.mxu1 %v1925_v13  ;;  %770 = vmatpush.msra.mxu3 %v1227_v4  ;;  %v672_v4 = vld [vmem:[%s1206_s17] sm:$0xff] }
 0x252   : > { %690 = vmatpush.msra.mxu0 %v1926_v16  ;;  %730 = vmatpush.msra.mxu2 %v1927_v10 }
 0x253   : > { %691 = vmatmul.f32.vlgmr.msra.gmra.mxu0 %v1675_v5  ;;  %731 = vmatmul.f32.vlgmr.msra.gmra.mxu2 %v1675_v5 }
 0x254   : > { %710 = vmatpush.msra.mxu1 %v1928_v19  ;;  %776 = vmatpush.msrb.mxu0 %v1442_v47  ;;  %v838_v47 = vld [vmem:[%s1902_s3 + $0x10] sm:$0xff] }
 0x255   : > { %711 = vmatmul.f32.vlgmr.msra.gmra.mxu1 %v1675_v5  ;;  %771 = vmatpush.msra.mxu3 %v1926_v16  ;;  %v885_v16 = vld [vmem:[%s1904_s5 + $0x40] sm:$0xff] }
 0x256   : > { %796 = vmatpush.msrb.mxu1 %v1447_v48  ;;  %777 = vmatpush.msrb.mxu0 %v1427_v44  ;;  %v840_v44 = vld [vmem:[%s1902_s3 + $0x20] sm:$0xff] }
 0x257   : > { %897 = vmatpush.msrb.mxu3 %v892_v54 }
 0x258   : > { %797 = vmatpush.msrb.mxu1 %v1432_v45  ;;  %778 = vmatpush.msrb.mxu0 %v1412_v41  ;;  %v843_v41 = vld [vmem:[%s1902_s3 + $0x38] sm:$0xff] }
 0x259   : > { %v839_v45 = vld [vmem:[%s1902_s3 + $0x18] sm:$0xff]  ;;  %898 = vmatpush.msrb.mxu3 %v891_v55 }
 0x25a   : > { %798 = vmatpush.msrb.mxu1 %v1417_v42  ;;  %779 = vmatpush.msrb.mxu0 %v1397_v38  ;;  %v846_v38 = vld [vmem:[%s1902_s3 + $0x50] sm:$0xff] }
 0x25b   : > { %v842_v42 = vld [vmem:[%s1902_s3 + $0x30] sm:$0xff]  ;;  %899 = vmatpush.msrb.mxu3 %v890_v56 }
 0x25c   : > { %799 = vmatpush.msrb.mxu1 %v1402_v39  ;;  %780 = vmatpush.msrb.mxu0 %v1382_v35  ;;  %v849_v35 = vld [vmem:[%s1902_s3 + $0x68] sm:$0xff] }
 0x25d   : > { %v845_v39 = vld [vmem:[%s1902_s3 + $0x48] sm:$0xff]  ;;  %900 = vmatpush.msrb.mxu3 %v889_v58 }
 0x25e   : > { %800 = vmatpush.msrb.mxu1 %v1387_v36  ;;  %781 = vmatpush.msrb.mxu0 %v1367_v32  ;;  %v848_v36 = vld [vmem:[%s1902_s3 + $0x60] sm:$0xff] }
 0x25f   : > { %901 = vmatpush.msrb.mxu3 %v888_v59 }
 0x260   : > { %801 = vmatpush.msrb.mxu1 %v1372_v33  ;;  %782 = vmatpush.msrb.mxu0 %v1352_v29  ;;  %v851_v33 = vld [vmem:[%s1902_s3 + $0x78] sm:$0xff] }
 0x261   : > { %856 = vmatpush.msrb.mxu2 %v851_v33  ;;  %902 = vmatpush.msrb.mxu3 %v887_v1  ;;  %v925_v33 = vld [vmem:[%s1906_s7 + $0x38] sm:$0xff] }
 0x262   : > { %802 = vmatpush.msrb.mxu1 %v1357_v30  ;;  %783 = vmatpush.msrb.mxu0 %v1337_v26 }
 0x263   : > { %857 = vmatpush.msrb.mxu2 %v850_v34  ;;  %903 = vmatpush.msrb.mxu3 %v886_v63  ;;  %v924_v34 = vld [vmem:[%s1906_s7 + $0x30] sm:$0xff] }
 0x264   : > { %803 = vmatpush.msrb.mxu1 %v1342_v27  ;;  %784 = vmatpush.msrb.mxu0 %v1322_v23  ;;  %v674_v23 = vld [vmem:[%s1206_s17 + $0x10] sm:$0xff] }
 0x265   : > { %858 = vmatpush.msrb.mxu2 %v849_v35  ;;  %904 = vmatpush.msrb.mxu3 %v885_v16  ;;  %v923_v35 = vld [vmem:[%s1906_s7 + $0x28] sm:$0xff] }
 0x266   : > { %804 = vmatpush.msrb.mxu1 %v1327_v24  ;;  %785 = vmatpush.msrb.mxu0 %v1307_v20 }
 0x267   : > { %859 = vmatpush.msrb.mxu2 %v848_v36  ;;  %v922_v36 = vld [vmem:[%s1906_s7 + $0x20] sm:$0xff] }
 0x268   : > { %805 = vmatpush.msrb.mxu1 %v1312_v21  ;;  %786 = vmatpush.msrb.mxu0 %v1292_v17 }
 0x269   : > { %860 = vmatpush.msrb.mxu2 %v847_v37  ;;  %v921_v37 = vld [vmem:[%s1906_s7 + $0x18] sm:$0xff] }
 0x26a   : > { %806 = vmatpush.msrb.mxu1 %v1297_v18  ;;  %787 = vmatpush.msrb.mxu0 %v1277_v14 }
 0x26b   : > { %861 = vmatpush.msrb.mxu2 %v846_v38  ;;  %v1092_v38 = vld [vmem:[%s1903_s4] ss:$0 sm:$0xff] }
 0x26c   : > { %807 = vmatpush.msrb.mxu1 %v1282_v15  ;;  %788 = vmatpush.msrb.mxu0 %v1262_v11  ;;  %v673_v15 = vld [vmem:[%s1206_s17 + $0x8] sm:$0xff] }
 0x26d   : > { %862 = vmatpush.msrb.mxu2 %v845_v39 }
 0x26e   : > { %808 = vmatpush.msrb.mxu1 %v1267_v12  ;;  %789 = vmatpush.msrb.mxu0 %v1247_v8 }
 0x26f   : > { %863 = vmatpush.msrb.mxu2 %v844_v40 }
 0x270   : > { %809 = vmatpush.msrb.mxu1 %v1252_v9  ;;  %790 = vmatpush.msrb.mxu0 %v1925_v13  ;;  %v1043_v13 = vld [vmem:[%s1206_s17 + $0x28] sm:$0xff] }
 0x271   : > { %864 = vmatpush.msrb.mxu2 %v843_v41 }
 0x272   : > { %810 = vmatpush.msrb.mxu1 %v1924_v6  ;;  %791 = vmatpush.msrb.mxu0 %v1928_v19  ;;  %v884_v19 = vld [vmem:[%s1904_s5 + $0x38] sm:$0xff] }
 0x273   : > { %865 = vmatpush.msrb.mxu2 %v842_v42  ;;  %905 = vmatpush.msrb.mxu3 %v884_v19  ;;  %v920_v42 = vld [vmem:[%s1906_s7 + $0x10] sm:$0xff] }
 0x274   : > { %811 = vmatpush.msrb.mxu1 %v1927_v10 }
 0x275   : > { %866 = vmatpush.msrb.mxu2 %v841_v43  ;;  %v919_v43 = vld [vmem:[%s1906_s7 + $0x8] sm:$0xff] }
 0x277   : > { %867 = vmatpush.msrb.mxu2 %v840_v44  ;;  %v918_v44 = vld [vmem:[%s1906_s7] sm:$0xff] }
 0x279   : > { %868 = vmatpush.msrb.mxu2 %v839_v45  ;;  %v1093_v45 = vld [vmem:[%s1905_s6] ss:$0 sm:$0xff] }
 0x27b   : > { %869 = vmatpush.msrb.mxu2 %v838_v47 }
 0x27d   : > { %870 = vmatpush.msrb.mxu2 %v837_v61  ;;  %v1094_v61 = vld [vmem:[%s1907_s8] ss:$0 sm:$0xff] }
 0x27f   : > { %871 = vmatpush.msrb.mxu2 %v836_v50 }
 0x2d0   : > { %v692_v7 = vpop.f32.mrf.mxu0 }
 0x2d1   : > { %v735_v14 = vadd.f32 %v692_v7, %v672_v4  ;;  %v883_v7 = vld [vmem:[%s1904_s5 + $0x30] sm:$0xff] }
 0x2d2   : > { %v712_v11 = vpop.f32.mrf.mxu1  ;;  %906 = vmatpush.msrb.mxu3 %v883_v7 }
 0x2d3   : > { %v736_v17 = vmul.f32 0.5, %v735_v14  ;;  %v740_v12 = vadd.f32 %v712_v11, %v673_v15  ;;  %v882_v14 = vld [vmem:[%s1904_s5 + $0x28] sm:$0xff]  ;;  %v881_v11 = vld [vmem:[%s1904_s5 + $0x20] sm:$0xff] }
 0x2d4   : > { %907 = vmatpush.msrb.mxu3 %v882_v14 }
 0x2d5   : > { %1095 = vtanh.f32 %v736_v17  ;;  %v741_v8 = vmul.f32 0.5, %v740_v12  ;;  %v880_v17 = vld [vmem:[%s1904_s5 + $0x18] sm:$0xff] }
 0x2d6   : > { %v732_v18 = vpop.f32.mrf.mxu2  ;;  %908 = vmatpush.msrb.mxu3 %v881_v11 }
 0x2d7   : > { %1097 = vtanh.f32 %v741_v8  ;;  %v745_v21 = vadd.f32 %v1452_v49, %v732_v18 }
 0x2d8   : > { %909 = vmatpush.msrb.mxu3 %v880_v17 }
 0x2db   : > { %v1096_v9 = vpop.eup %1095 }
 0x2dc   : > { %v738_v20 = vmul.f32 0.5, %v1096_v9 }
 0x2dd   : > { %v1098_v25 = vpop.eup %1097 }
 0x2de   : > { %v739_v22 = vadd.f32 0.5, %v738_v20  ;;  %v743_v27 = vmul.f32 0.5, %v1098_v25  ;;  %v933_v25 = vld [vmem:[%s1906_s7 + $0x78] sm:$0xff] }
 0x2df   : > { %938 = vmatpush.msra.mxu0 %v933_v25 }
 0x2e0   : > { %v746_v24 = vmul.f32 %v745_v21, %v739_v22  ;;  %v744_v28 = vadd.f32 0.5, %v743_v27  ;;  %v879_v22 = vld [vmem:[%s1904_s5 + $0x10] sm:$0xff]  ;;  %v931_v27 = vld [vmem:[%s1906_s7 + $0x68] sm:$0xff] }
 0x2e1   : > { %910 = vmatpush.msrb.mxu3 %v879_v22 }
 0x2e2   : > { %v747_v26 = vadd.f32 %v746_v24, %v674_v23  ;;  %v878_v23 = vld [vmem:[%s1904_s5 + $0x8] sm:$0xff]  ;;  %v877_v24 = vld [vmem:[%s1904_s5] sm:$0xff] }
 0x2e3   : > { %911 = vmatpush.msrb.mxu3 %v878_v23 }
 0x2e4   : > { %1099 = vtanh.f32 %v747_v26  ;;  %v932_v26 = vld [vmem:[%s1906_s7 + $0x70] sm:$0xff] }
 0x2e5   : > { %912 = vmatpush.msrb.mxu3 %v877_v24  ;;  %939 = vmatpush.msra.mxu0 %v932_v26 }
 0x2e7   : > { %940 = vmatpush.msra.mxu0 %v931_v27 }
 0x2ea   : > { %v1100_v29 = vpop.eup %1099 }
 0x2eb   : > { %v749_v30 = vsub.f32 %v1675_v5, %v1100_v29 }
 0x2ed   : > { %v750_v31 = vmul.f32 %v749_v30, %v744_v28  ;;  %v930_v28 = vld [vmem:[%s1906_s7 + $0x60] sm:$0xff]  ;;  %v928_v30 = vld [vmem:[%s1906_s7 + $0x50] sm:$0xff] }
 0x2ee   : > { %941 = vmatpush.msra.mxu0 %v930_v28 }
 0x2ef   : > { %v1724_v32 = vadd.f32 %v1100_v29, %v750_v31  ;;  %v929_v29 = vld [vmem:[%s1906_s7 + $0x58] sm:$0xff]  ;;  %v927_v31 = vld [vmem:[%s1906_s7 + $0x48] sm:$0xff] }
 0x2f0   : > { %942 = vmatpush.msra.mxu0 %v929_v29 }
 0x2f1   : > { %772 = vmatmul.f32.vlgmr.msra.gmra.mxu3 %v1724_v32  ;;  %792 = vmatmul.f32.vlgmr.msrb.gmra.mxu0 %v1724_v32 }
 0x2f2   : > { %812 = vmatmul.f32.vlgmr.msrb.gmra.mxu1 %v1724_v32  ;;  %943 = vmatpush.msra.mxu0 %v928_v30 }
 0x2f4   : > { %944 = vmatpush.msra.mxu0 %v927_v31 }
 0x36e   : > { %v793_v52 = vpop.f32.mrf.mxu0 }
 0x36f   : > { %v821_v57 = vadd.f32 %v1042_v51, %v793_v52  ;;  %v813_v2 = vpop.f32.mrf.mxu1 }
 0x370   : > { %v826_v5 = vadd.f32 %v1452_v49, %v813_v2 }
 0x371   : > { %v822_v62 = vmul.f32 0.5, %v821_v57 }
 0x374   : > { %v773_v48 = vpop.f32.mrf.mxu3 }
 0x375   : > { %v816_v0 = vadd.f32 %v1041_v46, %v773_v48 }
 0x377   : > { %v817_v53 = vmul.f32 0.5, %v816_v0 }
 0x379   : > { %1101 = vtanh.f32 %v817_v53 }
 0x37a   : > { %1103 = vtanh.f32 %v822_v62 }
 0x37f   : > { %v1102_v60 = vpop.eup %1101 }
 0x380   : > { %v819_v3 = vmul.f32 0.5, %v1102_v60  ;;  %v1104_v49 = vpop.eup %1103 }
 0x381   : > { %v824_v15 = vmul.f32 0.5, %v1104_v49 }
 0x382   : > { %v820_v6 = vadd.f32 0.5, %v819_v3 }
 0x383   : > { %v825_v8 = vadd.f32 0.5, %v824_v15 }
 0x384   : > { %v827_v10 = vmul.f32 %v826_v5, %v820_v6 }
 0x386   : > { %v828_v4 = vadd.f32 %v1043_v13, %v827_v10 }
 0x388   : > { %1105 = vtanh.f32 %v828_v4 }
 0x38e   : > { %v1106_v12 = vpop.eup %1105 }
 0x38f   : > { %v830_v18 = vsub.f32 %v1724_v32, %v1106_v12  ;;  %v926_v32 = vld [vmem:[%s1906_s7 + $0x40] sm:$0xff] }
 0x390   : > { %945 = vmatpush.msra.mxu0 %v926_v32 }
 0x391   : > { %v831_v9 = vmul.f32 %v830_v18, %v825_v8 }
 0x392   : > { %946 = vmatpush.msra.mxu0 %v925_v33 }
 0x393   : > { %v832_v20 = vadd.f32 %v1106_v12, %v831_v9 }
 0x394   : > { %947 = vmatpush.msra.mxu0 %v924_v34 }
 0x395   : > { %833 = vst [vmem:[#allocation2] sm:$0xff] %v832_v20  ;;  %v835_v21 = vmax.f32 %v832_v20, 0.0 }
 0x396   : > { %948 = vmatpush.msra.mxu0 %v923_v35 }
 0x397   : > { %872 = vmatmul.f32.vlgmr.msrb.gmra.mxu2 %v835_v21 }
 0x398   : > { %949 = vmatpush.msra.mxu0 %v922_v36 }
 0x39a   : > { %950 = vmatpush.msra.mxu0 %v921_v37 }
 0x39c   : > { %951 = vmatpush.msra.mxu0 %v920_v42 }
 0x39e   : > { %952 = vmatpush.msra.mxu0 %v919_v43 }
 0x3a0   : > { %953 = vmatpush.msra.mxu0 %v918_v44 }
 0x41a   : > { %v873_v39 = vpop.f32.mrf.mxu2 }
 0x41b   : > { %v874_v40 = vadd.f32 %v1092_v38, %v873_v39 }
 0x41d   : > { %v876_v41 = vmax.f32 %v874_v40, 0.0 }
 0x41f   : > { %913 = vmatmul.f32.vlgmr.msrb.gmra.mxu3 %v876_v41 }
 0x4a2   : > { %v914_v46 = vpop.f32.mrf.mxu3 }
 0x4a3   : > { %v915_v47 = vadd.f32 %v1093_v45, %v914_v46 }
 0x4a5   : > { %v917_v48 = vmax.f32 %v915_v47, 0.0 }
 0x4a7   : > { %954 = vmatmul.f32.vlgmr.msra.gmra.mxu0 %v917_v48 }
 0x524   : > { %v955_v0 = vpop.f32.mrf.mxu0 }
 0x525   : > { %v956_v50 = vadd.f32 %v1094_v61, %v955_v0 }
 0x527   : > { %958 = vst [vmem:[%s1908_s9] sm:$0xff] %v956_v50 }
 0x528 PF: > { %s19_s11 = sadd.s32 1, %s1129_s11   ;;  %s1929_s30 = smov %s1125_s10 }
 0x529   : > { %p16_p8 = scmp.ge.s32.totalorder %s19_s11, 5   ;;  %s1930_s10 = smov %s1932_s12 }
 0x52b   :  { %18 = sbr.rel (!%p16_p8) target bundleno = 2 (0x2), region = 101 }

</bundles_post_ra>
